<compile_context>
chip_gen: v6e
topology: v6e:2x2x1
jax: 0.10.0
libtpu: 0.0.40
codegen_flags: <defaults>
</compile_context>

<pallas_src>
import math
import functools

import jax
import jax.numpy as jnp
from jax import lax
from jax.experimental import pallas as pl
from jax.experimental.pallas import tpu as pltpu


# =============================================================================
# Helpers
# =============================================================================

def _round_up(x, m):
    return ((x + m - 1) // m) * m


# =============================================================================
# Tiled linear (optionally fused ReLU), bf16 MXU inputs, f32 accumulation
# =============================================================================

def _linear_kernel(x_ref, w_ref, b_ref, o_ref, acc_ref, *, activation):
    @pl.when(pl.program_id(2) == 0)
    def _():
        acc_ref[...] = jnp.zeros_like(acc_ref)

    acc_ref[...] += jnp.dot(x_ref[...], w_ref[...],
                            preferred_element_type=jnp.float32)

    @pl.when(pl.program_id(2) == pl.num_programs(2) - 1)
    def _():
        y = acc_ref[...] + b_ref[...]
        if activation == "relu":
            y = jnp.maximum(y, 0.0)
        o_ref[...] = y.astype(o_ref.dtype)


def linear(x2d, w, b, activation=None, out_dtype=jnp.bfloat16,
           *, tm=512, tn=512, tk=512):
    """x2d: [N, K], w: [K, M], b: [M] -> [N, M]. Padded, tiled, pipelined matmul."""
    N, K = x2d.shape
    M = w.shape[1]
    bm = min(tm, _round_up(N, 8))
    bn = min(tn, _round_up(M, 128))
    bk = min(tk, _round_up(K, 128))
    Np, Mp, Kp = _round_up(N, bm), _round_up(M, bn), _round_up(K, bk)

    xp = x2d if (Np == N and Kp == K) else jnp.pad(x2d, ((0, Np - N), (0, Kp - K)))
    wp = w if (Kp == K and Mp == M) else jnp.pad(w, ((0, Kp - K), (0, Mp - M)))
    bp = b if Mp == M else jnp.pad(b, (0, Mp - M))
    xp = xp.astype(jnp.bfloat16)
    wp = wp.astype(jnp.bfloat16)
    bp = bp.reshape(1, Mp).astype(jnp.float32)

    grid = (Np // bm, Mp // bn, Kp // bk)
    out = pl.pallas_call(
        functools.partial(_linear_kernel, activation=activation),
        out_shape=jax.ShapeDtypeStruct((Np, Mp), out_dtype),
        grid_spec=pltpu.PrefetchScalarGridSpec(
            num_scalar_prefetch=0,
            grid=grid,
            in_specs=[
                pl.BlockSpec((bm, bk), lambda i, j, k: (i, k)),
                pl.BlockSpec((bk, bn), lambda i, j, k: (k, j)),
                pl.BlockSpec((1, bn), lambda i, j, k: (0, j)),
            ],
            out_specs=pl.BlockSpec((bm, bn), lambda i, j, k: (i, j)),
            scratch_shapes=[pltpu.VMEM((bm, bn), jnp.float32)],
        ),
        compiler_params=pltpu.CompilerParams(
            dimension_semantics=("parallel", "parallel", "arbitrary")),
    )(xp, wp, bp)
    if Np != N or Mp != M:
        out = out[:N, :M]
    return out


# =============================================================================
# Tiled linear with fused (residual add + LayerNorm) epilogue
# =============================================================================

def _linear_res_ln_kernel(x_ref, w_ref, b_ref, r_ref, g_ref, beta_ref,
                          o_ref, acc_ref, *, eps):
    @pl.when(pl.program_id(1) == 0)
    def _():
        acc_ref[...] = jnp.zeros_like(acc_ref)

    acc_ref[...] += jnp.dot(x_ref[...], w_ref[...],
                            preferred_element_type=jnp.float32)

    @pl.when(pl.program_id(1) == pl.num_programs(1) - 1)
    def _():
        y = acc_ref[...] + b_ref[...] + r_ref[...].astype(jnp.float32)
        mu = jnp.mean(y, axis=-1, keepdims=True)
        var = jnp.mean(jnp.square(y - mu), axis=-1, keepdims=True)
        o_ref[...] = (((y - mu) * lax.rsqrt(var + eps)) * g_ref[...]
                      + beta_ref[...]).astype(o_ref.dtype)


def linear_residual_ln(x2d, w, b, residual, gamma, beta, *,
                       eps=1e-5, tm=256, tk=256):
    """LayerNorm(x2d @ w + b + residual) * gamma + beta  -> bf16 [N, M].

    The output feature dim M (= d_model) is kept whole so the LN reduction
    stays in-kernel; N (rows) and K (contraction) are tiled (padded if needed).
    """
    N, K = x2d.shape
    M = w.shape[1]
    bm = min(tm, _round_up(N, 8))
    bk = min(tk, _round_up(K, 128))
    Np, Kp = _round_up(N, bm), _round_up(K, bk)

    xp = x2d if (Np == N and Kp == K) else jnp.pad(x2d, ((0, Np - N), (0, Kp - K)))
    wp = w if Kp == K else jnp.pad(w, ((0, Kp - K), (0, 0)))
    rp = residual if Np == N else jnp.pad(residual, ((0, Np - N), (0, 0)))
    xp = xp.astype(jnp.bfloat16)
    wp = wp.astype(jnp.bfloat16)
    rp = rp.astype(jnp.bfloat16)

    grid = (Np // bm, Kp // bk)
    out = pl.pallas_call(
        functools.partial(_linear_res_ln_kernel, eps=eps),
        out_shape=jax.ShapeDtypeStruct((Np, M), jnp.bfloat16),
        grid_spec=pltpu.PrefetchScalarGridSpec(
            num_scalar_prefetch=0,
            grid=grid,
            in_specs=[
                pl.BlockSpec((bm, bk), lambda i, k: (i, k)),
                pl.BlockSpec((bk, M), lambda i, k: (k, 0)),
                pl.BlockSpec((1, M), lambda i, k: (0, 0)),
                pl.BlockSpec((bm, M), lambda i, k: (i, 0)),
                pl.BlockSpec((1, M), lambda i, k: (0, 0)),
                pl.BlockSpec((1, M), lambda i, k: (0, 0)),
            ],
            out_specs=pl.BlockSpec((bm, M), lambda i, k: (i, 0)),
            scratch_shapes=[pltpu.VMEM((bm, M), jnp.float32)],
        ),
        compiler_params=pltpu.CompilerParams(
            dimension_semantics=("parallel", "arbitrary"),
            vmem_limit_bytes=48 * 1024 * 1024),
    )(xp, wp, b.reshape(1, M).astype(jnp.float32), rp,
      gamma.reshape(1, M).astype(jnp.float32),
      beta.reshape(1, M).astype(jnp.float32))
    if Np != N:
        out = out[:N]
    return out


# =============================================================================
# Flash-style multi-head attention (head-group tiled, Sk-tiled online softmax)
# =============================================================================

def _flash_attn_kernel(q_ref, k_ref, v_ref, msk_ref, o_ref,
                       m_sc, l_sc, acc_sc):
    ki = pl.program_id(3)

    @pl.when(ki == 0)
    def _():
        m_sc[...] = jnp.full_like(m_sc, -jnp.inf)
        l_sc[...] = jnp.zeros_like(l_sc)
        acc_sc[...] = jnp.zeros_like(acc_sc)

    q = q_ref[0]                              # [hg, bq, dk] bf16 (scale pre-folded)
    k = k_ref[0]                              # [hg, bk, dk] bf16
    v = v_ref[0]                              # [hg, bk, dk] bf16
    mask = msk_ref[...]                       # [1, bq, bk]  f32, shared over heads

    s = jnp.einsum('hqd,hkd->hqk', q, k,
                   preferred_element_type=jnp.float32) + mask

    m_prev = m_sc[...]
    m_new = jnp.maximum(m_prev, s.max(axis=-1, keepdims=True))
    alpha = jnp.exp(m_prev - m_new)
    p = jnp.exp(s - m_new)
    l_sc[...] = alpha * l_sc[...] + p.sum(axis=-1, keepdims=True)
    acc_sc[...] = alpha * acc_sc[...] + jnp.einsum(
        'hqk,hkd->hqd', p.astype(v.dtype), v, preferred_element_type=jnp.float32)
    m_sc[...] = m_new

    @pl.when(ki == pl.num_programs(3) - 1)
    def _():
        inv_l = pl.reciprocal(l_sc[...], approx=True)
        o_ref[0] = (acc_sc[...] * inv_l).astype(o_ref.dtype)


def multi_head_flash_attention(q, k, v, mask3, *, tq=128, tkv=256, max_hg=8):
    """q: [B,H,Sq,dk], k/v: [B,H,Sk,dk], mask3: [Bm,Sq,Sk] (Bm in {1,B}) -> [B,H,Sq,dk]."""
    B, H, Sq, dk = q.shape
    Sk = k.shape[2]
    Bm = mask3.shape[0]
    bsel = 1 if Bm == B else 0

    hg = H if H <= max_hg else math.gcd(H, max_hg)
    if Sq <= tq:
        bq, Sqp = Sq, Sq
    else:
        bq, Sqp = tq, _round_up(Sq, tq)
    if Sk <= tkv:
        bkv, Skp = Sk, Sk
    else:
        bkv, Skp = tkv, _round_up(Sk, tkv)

    if Sqp != Sq:
        q = jnp.pad(q, ((0, 0), (0, 0), (0, Sqp - Sq), (0, 0)))
    if Skp != Sk:
        k = jnp.pad(k, ((0, 0), (0, 0), (0, Skp - Sk), (0, 0)))
        v = jnp.pad(v, ((0, 0), (0, 0), (0, Skp - Sk), (0, 0)))
    if Sqp != Sq or Skp != Sk:
        # Padded key columns must stay masked out (-1e9) for real query rows.
        mask3 = jnp.pad(mask3, ((0, 0), (0, Sqp - Sq), (0, Skp - Sk)),
                        constant_values=-1e9)

    q = q.astype(jnp.bfloat16)
    k = k.astype(jnp.bfloat16)
    v = v.astype(jnp.bfloat16)
    mask3 = mask3.astype(jnp.float32)

    grid = (B, H // hg, Sqp // bq, Skp // bkv)
    out = pl.pallas_call(
        _flash_attn_kernel,
        out_shape=jax.ShapeDtypeStruct((B, H, Sqp, dk), jnp.bfloat16),
        grid_spec=pltpu.PrefetchScalarGridSpec(
            num_scalar_prefetch=0,
            grid=grid,
            in_specs=[
                pl.BlockSpec((1, hg, bq, dk), lambda b, g, qi, ki: (b, g, qi, 0)),
                pl.BlockSpec((1, hg, bkv, dk), lambda b, g, qi, ki: (b, g, ki, 0)),
                pl.BlockSpec((1, hg, bkv, dk), lambda b, g, qi, ki: (b, g, ki, 0)),
                # Same mask block for every head group; batch-invariant masks map to b=0.
                pl.BlockSpec((1, bq, bkv), lambda b, g, qi, ki: (b * bsel, qi, ki)),
            ],
            out_specs=pl.BlockSpec((1, hg, bq, dk), lambda b, g, qi, ki: (b, g, qi, 0)),
            scratch_shapes=[
                pltpu.VMEM((hg, bq, 1), jnp.float32),   # running max
                pltpu.VMEM((hg, bq, 1), jnp.float32),   # running denominator
                pltpu.VMEM((hg, bq, dk), jnp.float32),  # running numerator
            ],
        ),
        compiler_params=pltpu.CompilerParams(
            dimension_semantics=("parallel", "parallel", "parallel", "arbitrary")),
    )(q, k, v, mask3)
    if Sqp != Sq:
        out = out[:, :, :Sq, :]
    return out


# =============================================================================
# Model glue (reshapes, parameter bookkeeping) in plain JAX
# =============================================================================

def positional_encoding(max_len, d_model):
    pos = jnp.arange(max_len, dtype=jnp.float32)[:, None]
    i = jnp.arange(0, d_model, 2, dtype=jnp.float32)
    angle = pos / jnp.power(10000.0, i / d_model)
    pe = jnp.zeros((max_len, d_model), jnp.float32)
    pe = pe.at[:, 0::2].set(jnp.sin(angle))
    pe = pe.at[:, 1::2].set(jnp.cos(angle))
    return pe


def _mask_to_3d(mask, Sq, Sk):
    """[Bm, 1, Sq_or_1, Sk] broadcastable additive mask -> [Bm, Sq, Sk] (no head dim)."""
    m = jnp.asarray(mask, jnp.float32)
    m = jnp.broadcast_to(m, (m.shape[0], m.shape[1], Sq, Sk))[:, 0]
    return m


def self_attention_block(p, x, mask, num_heads, norm_g, norm_b):
    B, S, D = x.shape
    H = num_heads
    dk = D // H
    # Fused QKV projection: one matmul producing [B*S, 3D] (bf16).
    qkv = linear(x.reshape(B * S, D), p["wqkv"]["w"], p["wqkv"]["b"])
    qkv = qkv.reshape(B, S, 3, H, dk).transpose(2, 0, 3, 1, 4)    # [3, B, H, S, dk]
    q, k, v = qkv[0], qkv[1], qkv[2]
    mask3 = _mask_to_3d(mask, S, S)
    ctx = multi_head_flash_attention(q, k, v, mask3)
    ctx = ctx.transpose(0, 2, 1, 3).reshape(B * S, D)
    # Wo projection fused with residual add + LayerNorm.
    out = linear_residual_ln(ctx, p["wo"]["w"], p["wo"]["b"],
                             x.reshape(B * S, D), norm_g, norm_b)
    return out.reshape(B, S, D)


def cross_attention_block(p, x, memory, mask, num_heads, norm_g, norm_b):
    B, Sq, D = x.shape
    Sk = memory.shape[1]
    H = num_heads
    dk = D // H
    q = linear(x.reshape(B * Sq, D), p["wq"]["w"], p["wq"]["b"])
    q = q.reshape(B, Sq, H, dk).transpose(0, 2, 1, 3)             # [B, H, Sq, dk]
    kv = linear(memory.reshape(B * Sk, D), p["wkv"]["w"], p["wkv"]["b"])
    kv = kv.reshape(B, Sk, 2, H, dk).transpose(2, 0, 3, 1, 4)     # [2, B, H, Sk, dk]
    k, v = kv[0], kv[1]
    mask3 = _mask_to_3d(mask, Sq, Sk)
    ctx = multi_head_flash_attention(q, k, v, mask3)
    ctx = ctx.transpose(0, 2, 1, 3).reshape(B * Sq, D)
    out = linear_residual_ln(ctx, p["wo"]["w"], p["wo"]["b"],
                             x.reshape(B * Sq, D), norm_g, norm_b)
    return out.reshape(B, Sq, D)


def ffn_block(p_ff1, p_ff2, x, norm_g, norm_b):
    B, S, D = x.shape
    h = linear(x.reshape(B * S, D), p_ff1["w"], p_ff1["b"], activation="relu")
    out = linear_residual_ln(h, p_ff2["w"], p_ff2["b"],
                             x.reshape(B * S, D), norm_g, norm_b)
    return out.reshape(B, S, D)


def encoder_layer(p, x, mask, num_heads):
    x = self_attention_block(p["attn"], x, mask, num_heads,
                             p["norm1"]["g"], p["norm1"]["b"])
    x = ffn_block(p["ff1"], p["ff2"], x, p["norm2"]["g"], p["norm2"]["b"])
    return x


def decoder_layer(p, x, memory, src_mask, trg_mask, num_heads):
    x = self_attention_block(p["self_attn"], x, trg_mask, num_heads,
                             p["norm1"]["g"], p["norm1"]["b"])
    x = cross_attention_block(p["cross_attn"], x, memory, src_mask, num_heads,
                              p["norm2"]["g"], p["norm2"]["b"])
    x = ffn_block(p["ff1"], p["ff2"], x, p["norm3"]["g"], p["norm3"]["b"])
    return x


def transformer_forward(params, src_tokens, trg_tokens, src_mask, trg_mask, *, num_heads):
    d_model = params["src_emb"].shape[1]
    B, S_src = src_tokens.shape
    _, S_trg = trg_tokens.shape

    # TODO(synk): embedding gather stays as an XLA gather (data-dependent row fetch);
    # sinusoidal PE table is precomputed once at init and sliced/added here.
    src = jnp.take(params["src_emb"], src_tokens, axis=0) * math.sqrt(d_model)
    src = src + params["pe"][None, :S_src]
    trg = jnp.take(params["trg_emb"], trg_tokens, axis=0) * math.sqrt(d_model)
    trg = trg + params["pe"][None, :S_trg]
    # dropout: identity (eval mode). Residual stream flows as bf16 from here on.
    src = src.astype(jnp.bfloat16)
    trg = trg.astype(jnp.bfloat16)

    for lp in params["enc_layers"]:
        src = encoder_layer(lp, src, src_mask, num_heads)
    memory = src
    for lp in params["dec_layers"]:
        trg = decoder_layer(lp, trg, memory, src_mask, trg_mask, num_heads)

    logits = linear(trg.reshape(B * S_trg, d_model),
                    params["fc_out"]["w"], params["fc_out"]["b"],
                    out_dtype=jnp.float32)
    return logits.reshape(B, S_trg, -1)


# =============================================================================
# Deterministic parameter init (weights stored bf16, biases / LN params f32)
# =============================================================================

def init_params(key, src_vocab, tgt_vocab, d_model, num_heads, d_ff, num_layers,
                max_len=64):
    counter = [0]
    dk = d_model // num_heads
    q_scale = 1.0 / math.sqrt(dk)

    def next_key():
        counter[0] += 1
        return jax.random.fold_in(key, counter[0])

    def dense_f32(fan_in, fan_out):
        kw, kb = jax.random.split(next_key())
        bound = 1.0 / math.sqrt(fan_in)
        w = jax.random.uniform(kw, (fan_in, fan_out), jnp.float32, -bound, bound)
        b = jax.random.uniform(kb, (fan_out,), jnp.float32, -bound, bound)
        return w, b

    def dense(fan_in, fan_out):
        w, b = dense_f32(fan_in, fan_out)
        return {"w": w.astype(jnp.bfloat16), "b": b}

    def norm():
        return {"g": jnp.ones((d_model,), jnp.float32),
                "b": jnp.zeros((d_model,), jnp.float32)}

    def mha_self():
        # Fused Q/K/V projection [D, 3D]; 1/sqrt(dk) folded into the Q columns.
        w, b = dense_f32(d_model, 3 * d_model)
        w = w.at[:, :d_model].multiply(q_scale)
        b = b.at[:d_model].multiply(q_scale)
        return {"wqkv": {"w": w.astype(jnp.bfloat16), "b": b},
                "wo": dense(d_model, d_model)}

    def mha_cross():
        # Q separate (decoder input, scale folded), K/V fused [D, 2D] (encoder memory).
        wq, bq = dense_f32(d_model, d_model)
        return {"wq": {"w": (wq * q_scale).astype(jnp.bfloat16), "b": bq * q_scale},
                "wkv": dense(d_model, 2 * d_model),
                "wo": dense(d_model, d_model)}

    return {
        "src_emb": jax.random.normal(next_key(), (src_vocab, d_model), jnp.float32),
        "trg_emb": jax.random.normal(next_key(), (tgt_vocab, d_model), jnp.float32),
        "pe": positional_encoding(max_len, d_model),
        "enc_layers": [
            {
                "attn": mha_self(), "norm1": norm(),
                "ff1": dense(d_model, d_ff), "ff2": dense(d_ff, d_model),
                "norm2": norm(),
            }
            for _ in range(num_layers)
        ],
        "dec_layers": [
            {
                "self_attn": mha_self(), "norm1": norm(),
                "cross_attn": mha_cross(), "norm2": norm(),
                "ff1": dense(d_model, d_ff), "ff2": dense(d_ff, d_model),
                "norm3": norm(),
            }
            for _ in range(num_layers)
        ],
        "fc_out": dense(d_model, tgt_vocab),
    }


# =============================================================================
# Main
# =============================================================================

if __name__ == "__main__":
    B, S = 2, 8
    d_model, num_heads, d_ff, num_layers = 32, 4, 64, 2
    src_vocab, tgt_vocab = 50, 60

    key = jax.random.PRNGKey(0)
    k_src, k_trg, k_par = jax.random.split(key, 3)

    src_tokens = jax.random.randint(k_src, (B, S), 0, src_vocab)
    trg_tokens = jax.random.randint(k_trg, (B, S), 0, tgt_vocab)

    # Additive masks (0 = attend, -1e9 = blocked), matching the 0/-inf convention
    # of generate_square_subsequent_mask. src_mask varies per batch ([B,1,1,S]);
    # trg_mask is batch-invariant causal ([1,1,S,S]).
    src_mask = jnp.zeros((B, 1, 1, S), jnp.float32)
    causal = jnp.where(jnp.triu(jnp.ones((S, S), jnp.float32), k=1) == 1.0, -1e9, 0.0)
    trg_mask = causal[None, None, :, :]

    params = init_params(k_par, src_vocab, tgt_vocab, d_model, num_heads, d_ff,
                         num_layers, max_len=max(S, 16))

    fwd = jax.jit(functools.partial(transformer_forward, num_heads=num_heads))
    logits = fwd(params, src_tokens, trg_tokens, src_mask, trg_mask)
    jax.block_until_ready(logits)

    assert logits.shape == (B, S, tgt_vocab), logits.shape
    assert bool(jnp.all(jnp.isfinite(logits)))
    print("KERNEL_OK")
</pallas_src>

<mosaic_0001>
module attributes {stable_mosaic.version = 11 : i64} {
  func.func @_linear_kernel(%arg0: i32, %arg1: i32, %arg2: i32, %arg3: memref<16x128xbf16, #tpu.memory_space<vmem>>, %arg4: memref<128x128xbf16, #tpu.memory_space<vmem>>, %arg5: memref<1x128xf32, #tpu.memory_space<vmem>>, %arg6: memref<16x128xbf16, #tpu.memory_space<vmem>>, %arg7: memref<16x128xf32, #tpu.memory_space<vmem>>) attributes {dimension_semantics = [#tpu.dimension_semantics<parallel>, #tpu.dimension_semantics<parallel>, #tpu.dimension_semantics<arbitrary>], iteration_bounds = array<i64: 1, 1, 1>, scalar_prefetch = 0 : i64, scratch_operands = 1 : i64, tpu.core_type = #tpu.core_type<tc>, window_params = [{transform_indices = @transform_0, window_bounds = array<i64: 16, 128>}, {transform_indices = @transform_1, window_bounds = array<i64: 128, 128>}, {transform_indices = @transform_2, window_bounds = array<i64: 1, 128>}, {transform_indices = @transform_3, window_bounds = array<i64: 16, 128>}]} {
    %c0_i32 = arith.constant 0 : i32
    %0 = arith.cmpi eq, %arg2, %c0_i32 : i32
    %1 = arith.extui %0 : i1 to i32
    %c0_i32_0 = arith.constant 0 : i32
    %2 = arith.cmpi ne, %1, %c0_i32_0 : i32
    scf.if %2 {
      %cst_10 = arith.constant 0.000000e+00 : f32
      %12 = vector.broadcast %cst_10 : f32 to vector<16x128xf32>
      %c0_11 = arith.constant 0 : index
      %c0_12 = arith.constant 0 : index
      %13 = vector.load %arg7[%c0_11, %c0_12] : memref<16x128xf32, #tpu.memory_space<vmem>>, vector<16x128xf32>
      tpu.vector_store %arg7[%c0_11, %c0_12], %12 {strides = array<i32>} : memref<16x128xf32, #tpu.memory_space<vmem>>, vector<16x128xf32>,
    } else {
    }
    %c0 = arith.constant 0 : index
    %c0_1 = arith.constant 0 : index
    %3 = vector.load %arg7[%c0, %c0_1] : memref<16x128xf32, #tpu.memory_space<vmem>>, vector<16x128xf32>
    %c0_2 = arith.constant 0 : index
    %c0_3 = arith.constant 0 : index
    %4 = vector.load %arg3[%c0_2, %c0_3] : memref<16x128xbf16, #tpu.memory_space<vmem>>, vector<16x128xbf16>
    %c0_4 = arith.constant 0 : index
    %c0_5 = arith.constant 0 : index
    %5 = vector.load %arg4[%c0_4, %c0_5] : memref<128x128xbf16, #tpu.memory_space<vmem>>, vector<128x128xbf16>
    %cst = arith.constant dense<0.000000e+00> : vector<16x128xf32>
    %6 = tpu.matmul %4, %5, %cst {dimension_numbers = #tpu.dot_dimension_numbers<[1], [0], [0], [1], [0, 0, 1, 1], [], []>} : vector<16x128xbf16>, vector<128x128xbf16>, vector<16x128xf32> -> vector<16x128xf32>
    %7 = arith.addf %3, %6 : vector<16x128xf32>
    %c0_6 = arith.constant 0 : index
    %c0_7 = arith.constant 0 : index
    %8 = vector.load %arg7[%c0_6, %c0_7] : memref<16x128xf32, #tpu.memory_space<vmem>>, vector<16x128xf32>
    tpu.vector_store %arg7[%c0_6, %c0_7], %7 {strides = array<i32>} : memref<16x128xf32, #tpu.memory_space<vmem>>, vector<16x128xf32>,
    %c0_i32_8 = arith.constant 0 : i32
    %9 = arith.cmpi eq, %arg2, %c0_i32_8 : i32
    %10 = arith.extui %9 : i1 to i32
    %c0_i32_9 = arith.constant 0 : i32
    %11 = arith.cmpi ne, %10, %c0_i32_9 : i32
    scf.if %11 {
      %c0_10 = arith.constant 0 : index
      %c0_11 = arith.constant 0 : index
      %12 = vector.load %arg7[%c0_10, %c0_11] : memref<16x128xf32, #tpu.memory_space<vmem>>, vector<16x128xf32>
      %c0_12 = arith.constant 0 : index
      %c0_13 = arith.constant 0 : index
      %13 = vector.load %arg5[%c0_12, %c0_13] : memref<1x128xf32, #tpu.memory_space<vmem>>, vector<1x128xf32>
      %14 = vector.broadcast %13 : vector<1x128xf32> to vector<16x128xf32>
      %15 = arith.addf %12, %14 : vector<16x128xf32>
      %16 = arith.truncf %15 : vector<16x128xf32> to vector<16x128xbf16>
      %c0_14 = arith.constant 0 : index
      %c0_15 = arith.constant 0 : index
      %17 = vector.load %arg6[%c0_14, %c0_15] : memref<16x128xbf16, #tpu.memory_space<vmem>>, vector<16x128xbf16>
      tpu.vector_store %arg6[%c0_14, %c0_15], %16 {strides = array<i32>} : memref<16x128xbf16, #tpu.memory_space<vmem>>, vector<16x128xbf16>,
    } else {
    }
    return
  }
  func.func @transform_0(%arg0: i32, %arg1: i32, %arg2: i32) -> (i32, i32) {
    %c0_i32 = arith.constant 0 : i32
    return %arg0, %arg2 : i32, i32
  }
  func.func @transform_1(%arg0: i32, %arg1: i32, %arg2: i32) -> (i32, i32) {
    %c0_i32 = arith.constant 0 : i32
    return %arg2, %arg1 : i32, i32
  }
  func.func @transform_2(%arg0: i32, %arg1: i32, %arg2: i32) -> (i32, i32) {
    %c0_i32 = arith.constant 0 : i32
    %c0_i32_0 = arith.constant 0 : i32
    return %c0_i32, %arg1 : i32, i32
  }
  func.func @transform_3(%arg0: i32, %arg1: i32, %arg2: i32) -> (i32, i32) {
    %c0_i32 = arith.constant 0 : i32
    return %arg0, %arg1 : i32, i32
  }
}

module attributes {stable_mosaic.version = 11 : i64} {
  func.func @_flash_attn_kernel(%arg0: i32, %arg1: i32, %arg2: i32, %arg3: i32, %arg4: memref<1x4x8x8xbf16, #tpu.memory_space<vmem>>, %arg5: memref<1x4x8x8xbf16, #tpu.memory_space<vmem>>, %arg6: memref<1x4x8x8xbf16, #tpu.memory_space<vmem>>, %arg7: memref<1x8x8xf32, #tpu.memory_space<vmem>>, %arg8: memref<1x4x8x8xbf16, #tpu.memory_space<vmem>>, %arg9: memref<4x8x1xf32, #tpu.memory_space<vmem>>, %arg10: memref<4x8x1xf32, #tpu.memory_space<vmem>>, %arg11: memref<4x8x8xf32, #tpu.memory_space<vmem>>) attributes {dimension_semantics = [#tpu.dimension_semantics<parallel>, #tpu.dimension_semantics<parallel>, #tpu.dimension_semantics<parallel>, #tpu.dimension_semantics<arbitrary>], iteration_bounds = array<i64: 2, 1, 1, 1>, scalar_prefetch = 0 : i64, scratch_operands = 3 : i64, tpu.core_type = #tpu.core_type<tc>, window_params = [{transform_indices = @transform_0, window_bounds = array<i64: 1, 4, 8, 8>}, {transform_indices = @transform_1, window_bounds = array<i64: 1, 4, 8, 8>}, {transform_indices = @transform_2, window_bounds = array<i64: 1, 4, 8, 8>}, {transform_indices = @transform_3, window_bounds = array<i64: 1, 8, 8>}, {transform_indices = @transform_4, window_bounds = array<i64: 1, 4, 8, 8>}]} {
    %c0_i32 = arith.constant 0 : i32
    %0 = arith.cmpi eq, %arg3, %c0_i32 : i32
    %1 = arith.extui %0 : i1 to i32
    %c0_i32_0 = arith.constant 0 : i32
    %2 = arith.cmpi ne, %1, %c0_i32_0 : i32
    scf.if %2 {
      %cst_38 = arith.constant 0xFF800000 : f32
      %39 = vector.broadcast %cst_38 : f32 to vector<4x8x1xf32>
      %c0_39 = arith.constant 0 : index
      %c0_40 = arith.constant 0 : index
      %c0_41 = arith.constant 0 : index
      %40 = vector.load %arg9[%c0_39, %c0_40, %c0_41] : memref<4x8x1xf32, #tpu.memory_space<vmem>>, vector<4x8x1xf32>
      tpu.vector_store %arg9[%c0_39, %c0_40, %c0_41], %39 {strides = array<i32>} : memref<4x8x1xf32, #tpu.memory_space<vmem>>, vector<4x8x1xf32>,
      %cst_42 = arith.constant 0.000000e+00 : f32
      %41 = vector.broadcast %cst_42 : f32 to vector<4x8x1xf32>
      %c0_43 = arith.constant 0 : index
      %c0_44 = arith.constant 0 : index
      %c0_45 = arith.constant 0 : index
      %42 = vector.load %arg10[%c0_43, %c0_44, %c0_45] : memref<4x8x1xf32, #tpu.memory_space<vmem>>, vector<4x8x1xf32>
      tpu.vector_store %arg10[%c0_43, %c0_44, %c0_45], %41 {strides = array<i32>} : memref<4x8x1xf32, #tpu.memory_space<vmem>>, vector<4x8x1xf32>,
      %cst_46 = arith.constant 0.000000e+00 : f32
      %43 = vector.broadcast %cst_46 : f32 to vector<4x8x8xf32>
      %c0_47 = arith.constant 0 : index
      %c0_48 = arith.constant 0 : index
      %c0_49 = arith.constant 0 : index
      %44 = vector.load %arg11[%c0_47, %c0_48, %c0_49] : memref<4x8x8xf32, #tpu.memory_space<vmem>>, vector<4x8x8xf32>
      tpu.vector_store %arg11[%c0_47, %c0_48, %c0_49], %43 {strides = array<i32>} : memref<4x8x8xf32, #tpu.memory_space<vmem>>, vector<4x8x8xf32>,
    } else {
    }
    %c0 = arith.constant 0 : index
    %c0_1 = arith.constant 0 : index
    %c0_2 = arith.constant 0 : index
    %c0_3 = arith.constant 0 : index
    %3 = vector.load %arg4[%c0, %c0_1, %c0_2, %c0_3] : memref<1x4x8x8xbf16, #tpu.memory_space<vmem>>, vector<1x4x8x8xbf16>
    %4 = vector.shape_cast %3 : vector<1x4x8x8xbf16> to vector<4x8x8xbf16>
    %c0_4 = arith.constant 0 : index
    %c0_5 = arith.constant 0 : index
    %c0_6 = arith.constant 0 : index
    %c0_7 = arith.constant 0 : index
    %5 = vector.load %arg5[%c0_4, %c0_5, %c0_6, %c0_7] : memref<1x4x8x8xbf16, #tpu.memory_space<vmem>>, vector<1x4x8x8xbf16>
    %6 = vector.shape_cast %5 : vector<1x4x8x8xbf16> to vector<4x8x8xbf16>
    %c0_8 = arith.constant 0 : index
    %c0_9 = arith.constant 0 : index
    %c0_10 = arith.constant 0 : index
    %c0_11 = arith.constant 0 : index
    %7 = vector.load %arg6[%c0_8, %c0_9, %c0_10, %c0_11] : memref<1x4x8x8xbf16, #tpu.memory_space<vmem>>, vector<1x4x8x8xbf16>
    %8 = vector.shape_cast %7 : vector<1x4x8x8xbf16> to vector<4x8x8xbf16>
    %c0_12 = arith.constant 0 : index
    %c0_13 = arith.constant 0 : index
    %c0_14 = arith.constant 0 : index
    %9 = vector.load %arg7[%c0_12, %c0_13, %c0_14] : memref<1x8x8xf32, #tpu.memory_space<vmem>>, vector<1x8x8xf32>
    "tpu.trace_start"() <{level = 10 : i32, message = "hqd,hkd->hqk"}> : () -> ()
    %cst = arith.constant dense<0.000000e+00> : vector<4x8x8xf32>
    %10 = tpu.matmul %4, %6, %cst {dimension_numbers = #tpu.dot_dimension_numbers<[2], [2], [1], [1], [0, 0, 0, 1, 1, 1], [0], [0]>} : vector<4x8x8xbf16>, vector<4x8x8xbf16>, vector<4x8x8xf32> -> vector<4x8x8xf32>
    "tpu.trace_stop"() : () -> ()
    %11 = vector.broadcast %9 : vector<1x8x8xf32> to vector<4x8x8xf32>
    %12 = arith.addf %10, %11 : vector<4x8x8xf32>
    %c0_15 = arith.constant 0 : index
    %c0_16 = arith.constant 0 : index
    %c0_17 = arith.constant 0 : index
    %13 = vector.load %arg9[%c0_15, %c0_16, %c0_17] : memref<4x8x1xf32, #tpu.memory_space<vmem>>, vector<4x8x1xf32>
    %cst_18 = arith.constant dense<0xFF800000> : vector<4x8xf32>
    %14 = vector.multi_reduction <maximumf>, %12, %cst_18 [2] : vector<4x8x8xf32> to vector<4x8xf32>
    %15 = vector.shape_cast %14 : vector<4x8xf32> to vector<4x8x1xf32>
    %16 = arith.maximumf %13, %15 : vector<4x8x1xf32>
    %17 = arith.subf %13, %16 : vector<4x8x1xf32>
    %18 = math.exp %17 : vector<4x8x1xf32>
    %19 = vector.broadcast %16 : vector<4x8x1xf32> to vector<4x8x8xf32>
    %20 = arith.subf %12, %19 : vector<4x8x8xf32>
    %21 = math.exp %20 : vector<4x8x8xf32>
    %c0_19 = arith.constant 0 : index
    %c0_20 = arith.constant 0 : index
    %c0_21 = arith.constant 0 : index
    %22 = vector.load %arg10[%c0_19, %c0_20, %c0_21] : memref<4x8x1xf32, #tpu.memory_space<vmem>>, vector<4x8x1xf32>
    %23 = arith.mulf %18, %22 : vector<4x8x1xf32>
    %cst_22 = arith.constant dense<0.000000e+00> : vector<4x8xf32>
    %24 = vector.multi_reduction <add>, %21, %cst_22 [2] : vector<4x8x8xf32> to vector<4x8xf32>
    %25 = vector.shape_cast %24 : vector<4x8xf32> to vector<4x8x1xf32>
    %26 = arith.addf %23, %25 : vector<4x8x1xf32>
    %c0_23 = arith.constant 0 : index
    %c0_24 = arith.constant 0 : index
    %c0_25 = arith.constant 0 : index
    %27 = vector.load %arg10[%c0_23, %c0_24, %c0_25] : memref<4x8x1xf32, #tpu.memory_space<vmem>>, vector<4x8x1xf32>
    tpu.vector_store %arg10[%c0_23, %c0_24, %c0_25], %26 {strides = array<i32>} : memref<4x8x1xf32, #tpu.memory_space<vmem>>, vector<4x8x1xf32>,
    %c0_26 = arith.constant 0 : index
    %c0_27 = arith.constant 0 : index
    %c0_28 = arith.constant 0 : index
    %28 = vector.load %arg11[%c0_26, %c0_27, %c0_28] : memref<4x8x8xf32, #tpu.memory_space<vmem>>, vector<4x8x8xf32>
    %29 = vector.broadcast %18 : vector<4x8x1xf32> to vector<4x8x8xf32>
    %30 = arith.mulf %29, %28 : vector<4x8x8xf32>
    %31 = arith.truncf %21 : vector<4x8x8xf32> to vector<4x8x8xbf16>
    "tpu.trace_start"() <{level = 10 : i32, message = "hqk,hkd->hqd"}> : () -> ()
    %cst_29 = arith.constant dense<0.000000e+00> : vector<4x8x8xf32>
    %32 = tpu.matmul %31, %8, %cst_29 {dimension_numbers = #tpu.dot_dimension_numbers<[2], [1], [1], [2], [0, 0, 0, 1, 1, 2], [0], [0]>} : vector<4x8x8xbf16>, vector<4x8x8xbf16>, vector<4x8x8xf32> -> vector<4x8x8xf32>
    "tpu.trace_stop"() : () -> ()
    %33 = arith.addf %30, %32 : vector<4x8x8xf32>
    %c0_30 = arith.constant 0 : index
    %c0_31 = arith.constant 0 : index
    %c0_32 = arith.constant 0 : index
    %34 = vector.load %arg11[%c0_30, %c0_31, %c0_32] : memref<4x8x8xf32, #tpu.memory_space<vmem>>, vector<4x8x8xf32>
    tpu.vector_store %arg11[%c0_30, %c0_31, %c0_32], %33 {strides = array<i32>} : memref<4x8x8xf32, #tpu.memory_space<vmem>>, vector<4x8x8xf32>,
    %c0_33 = arith.constant 0 : index
    %c0_34 = arith.constant 0 : index
    %c0_35 = arith.constant 0 : index
    %35 = vector.load %arg9[%c0_33, %c0_34, %c0_35] : memref<4x8x1xf32, #tpu.memory_space<vmem>>, vector<4x8x1xf32>
    tpu.vector_store %arg9[%c0_33, %c0_34, %c0_35], %16 {strides = array<i32>} : memref<4x8x1xf32, #tpu.memory_space<vmem>>, vector<4x8x1xf32>,
    %c0_i32_36 = arith.constant 0 : i32
    %36 = arith.cmpi eq, %arg3, %c0_i32_36 : i32
    %37 = arith.extui %36 : i1 to i32
    %c0_i32_37 = arith.constant 0 : i32
    %38 = arith.cmpi ne, %37, %c0_i32_37 : i32
    scf.if %38 {
      %c0_38 = arith.constant 0 : index
      %c0_39 = arith.constant 0 : index
      %c0_40 = arith.constant 0 : index
      %39 = vector.load %arg10[%c0_38, %c0_39, %c0_40] : memref<4x8x1xf32, #tpu.memory_space<vmem>>, vector<4x8x1xf32>
      %40 = tpu.reciprocal %39 {approx = true} : vector<4x8x1xf32> -> vector<4x8x1xf32>
      %c0_41 = arith.constant 0 : index
      %c0_42 = arith.constant 0 : index
      %c0_43 = arith.constant 0 : index
      %41 = vector.load %arg11[%c0_41, %c0_42, %c0_43] : memref<4x8x8xf32, #tpu.memory_space<vmem>>, vector<4x8x8xf32>
      %42 = vector.broadcast %40 : vector<4x8x1xf32> to vector<4x8x8xf32>
      %43 = arith.mulf %41, %42 : vector<4x8x8xf32>
      %44 = arith.truncf %43 : vector<4x8x8xf32> to vector<4x8x8xbf16>
      %c0_44 = arith.constant 0 : index
      %c0_45 = arith.constant 0 : index
      %c0_46 = arith.constant 0 : index
      %c0_47 = arith.constant 0 : index
      %45 = vector.load %arg8[%c0_44, %c0_45, %c0_46, %c0_47] : memref<1x4x8x8xbf16, #tpu.memory_space<vmem>>, vector<1x4x8x8xbf16>
      %46 = vector.shape_cast %45 : vector<1x4x8x8xbf16> to vector<4x8x8xbf16>
      %47 = vector.shape_cast %44 : vector<4x8x8xbf16> to vector<1x4x8x8xbf16>
      tpu.vector_store %arg8[%c0_44, %c0_45, %c0_46, %c0_47], %47 {strides = array<i32>} : memref<1x4x8x8xbf16, #tpu.memory_space<vmem>>, vector<1x4x8x8xbf16>,
    } else {
    }
    return
  }
  func.func @transform_0(%arg0: i32, %arg1: i32, %arg2: i32, %arg3: i32) -> (i32, i32, i32, i32) {
    %c0_i32 = arith.constant 0 : i32
    %c0_i32_0 = arith.constant 0 : i32
    return %arg0, %arg1, %arg2, %c0_i32 : i32, i32, i32, i32
  }
  func.func @transform_1(%arg0: i32, %arg1: i32, %arg2: i32, %arg3: i32) -> (i32, i32, i32, i32) {
    %c0_i32 = arith.constant 0 : i32
    %c0_i32_0 = arith.constant 0 : i32
    return %arg0, %arg1, %arg3, %c0_i32 : i32, i32, i32, i32
  }
  func.func @transform_2(%arg0: i32, %arg1: i32, %arg2: i32, %arg3: i32) -> (i32, i32, i32, i32) {
    %c0_i32 = arith.constant 0 : i32
    %c0_i32_0 = arith.constant 0 : i32
    return %arg0, %arg1, %arg3, %c0_i32 : i32, i32, i32, i32
  }
  func.func @transform_3(%arg0: i32, %arg1: i32, %arg2: i32, %arg3: i32) -> (i32, i32, i32) {
    %c0_i32 = arith.constant 0 : i32
    %0 = arith.muli %arg0, %c0_i32 : i32
    %c0_i32_0 = arith.constant 0 : i32
    return %0, %arg2, %arg3 : i32, i32, i32
  }
  func.func @transform_4(%arg0: i32, %arg1: i32, %arg2: i32, %arg3: i32) -> (i32, i32, i32, i32) {
    %c0_i32 = arith.constant 0 : i32
    %c0_i32_0 = arith.constant 0 : i32
    return %arg0, %arg1, %arg2, %c0_i32 : i32, i32, i32, i32
  }
}

module attributes {stable_mosaic.version = 11 : i64} {
  func.func @_linear_res_ln_kernel(%arg0: i32, %arg1: i32, %arg2: memref<16x128xbf16, #tpu.memory_space<vmem>>, %arg3: memref<128x32xbf16, #tpu.memory_space<vmem>>, %arg4: memref<1x32xf32, #tpu.memory_space<vmem>>, %arg5: memref<16x32xbf16, #tpu.memory_space<vmem>>, %arg6: memref<1x32xf32, #tpu.memory_space<vmem>>, %arg7: memref<1x32xf32, #tpu.memory_space<vmem>>, %arg8: memref<16x32xbf16, #tpu.memory_space<vmem>>, %arg9: memref<16x32xf32, #tpu.memory_space<vmem>>) attributes {dimension_semantics = [#tpu.dimension_semantics<parallel>, #tpu.dimension_semantics<arbitrary>], iteration_bounds = array<i64: 1, 1>, scalar_prefetch = 0 : i64, scratch_operands = 1 : i64, tpu.core_type = #tpu.core_type<tc>, window_params = [{transform_indices = @transform_0, window_bounds = array<i64: 16, 128>}, {transform_indices = @transform_1, window_bounds = array<i64: 128, 32>}, {pipeline_mode = #tpu.pipeline_mode<synchronous>, transform_indices = @transform_2, window_bounds = array<i64: 1, 32>}, {transform_indices = @transform_3, window_bounds = array<i64: 16, 32>}, {pipeline_mode = #tpu.pipeline_mode<synchronous>, transform_indices = @transform_4, window_bounds = array<i64: 1, 32>}, {pipeline_mode = #tpu.pipeline_mode<synchronous>, transform_indices = @transform_5, window_bounds = array<i64: 1, 32>}, {transform_indices = @transform_6, window_bounds = array<i64: 16, 32>}]} {
    %c0_i32 = arith.constant 0 : i32
    %0 = arith.cmpi eq, %arg1, %c0_i32 : i32
    %1 = arith.extui %0 : i1 to i32
    %c0_i32_0 = arith.constant 0 : i32
    %2 = arith.cmpi ne, %1, %c0_i32_0 : i32
    scf.if %2 {
      %cst_10 = arith.constant 0.000000e+00 : f32
      %12 = vector.broadcast %cst_10 : f32 to vector<16x32xf32>
      %c0_11 = arith.constant 0 : index
      %c0_12 = arith.constant 0 : index
      %13 = vector.load %arg9[%c0_11, %c0_12] : memref<16x32xf32, #tpu.memory_space<vmem>>, vector<16x32xf32>
      tpu.vector_store %arg9[%c0_11, %c0_12], %12 {strides = array<i32>} : memref<16x32xf32, #tpu.memory_space<vmem>>, vector<16x32xf32>,
    } else {
    }
    %c0 = arith.constant 0 : index
    %c0_1 = arith.constant 0 : index
    %3 = vector.load %arg9[%c0, %c0_1] : memref<16x32xf32, #tpu.memory_space<vmem>>, vector<16x32xf32>
    %c0_2 = arith.constant 0 : index
    %c0_3 = arith.constant 0 : index
    %4 = vector.load %arg2[%c0_2, %c0_3] : memref<16x128xbf16, #tpu.memory_space<vmem>>, vector<16x128xbf16>
    %c0_4 = arith.constant 0 : index
    %c0_5 = arith.constant 0 : index
    %5 = vector.load %arg3[%c0_4, %c0_5] : memref<128x32xbf16, #tpu.memory_space<vmem>>, vector<128x32xbf16>
    %cst = arith.constant dense<0.000000e+00> : vector<16x32xf32>
    %6 = tpu.matmul %4, %5, %cst {dimension_numbers = #tpu.dot_dimension_numbers<[1], [0], [0], [1], [0, 0, 1, 1], [], []>} : vector<16x128xbf16>, vector<128x32xbf16>, vector<16x32xf32> -> vector<16x32xf32>
    %7 = arith.addf %3, %6 : vector<16x32xf32>
    %c0_6 = arith.constant 0 : index
    %c0_7 = arith.constant 0 : index
    %8 = vector.load %arg9[%c0_6, %c0_7] : memref<16x32xf32, #tpu.memory_space<vmem>>, vector<16x32xf32>
    tpu.vector_store %arg9[%c0_6, %c0_7], %7 {strides = array<i32>} : memref<16x32xf32, #tpu.memory_space<vmem>>, vector<16x32xf32>,
    %c0_i32_8 = arith.constant 0 : i32
    %9 = arith.cmpi eq, %arg1, %c0_i32_8 : i32
    %10 = arith.extui %9 : i1 to i32
    %c0_i32_9 = arith.constant 0 : i32
    %11 = arith.cmpi ne, %10, %c0_i32_9 : i32
    scf.if %11 {
      %c0_10 = arith.constant 0 : index
      %c0_11 = arith.constant 0 : index
      %12 = vector.load %arg9[%c0_10, %c0_11] : memref<16x32xf32, #tpu.memory_space<vmem>>, vector<16x32xf32>
      %c0_12 = arith.constant 0 : index
      %c0_13 = arith.constant 0 : index
      %13 = vector.load %arg4[%c0_12, %c0_13] : memref<1x32xf32, #tpu.memory_space<vmem>>, vector<1x32xf32>
      %14 = vector.broadcast %13 : vector<1x32xf32> to vector<16x32xf32>
      %15 = arith.addf %12, %14 : vector<16x32xf32>
      %c0_14 = arith.constant 0 : index
      %c0_15 = arith.constant 0 : index
      %16 = vector.load %arg5[%c0_14, %c0_15] : memref<16x32xbf16, #tpu.memory_space<vmem>>, vector<16x32xbf16>
      %17 = arith.extf %16 : vector<16x32xbf16> to vector<16x32xf32>
      %18 = arith.addf %15, %17 : vector<16x32xf32>
      %cst_16 = arith.constant dense<0.000000e+00> : vector<16xf32>
      %19 = vector.multi_reduction <add>, %18, %cst_16 [1] : vector<16x32xf32> to vector<16xf32>
      %20 = vector.shape_cast %19 : vector<16xf32> to vector<16x1xf32>
      %cst_17 = arith.constant 3.200000e+01 : f32
      %21 = vector.broadcast %cst_17 : f32 to vector<16x1xf32>
      %22 = arith.divf %20, %21 : vector<16x1xf32>
      %23 = vector.broadcast %22 : vector<16x1xf32> to vector<16x32xf32>
      %24 = arith.subf %18, %23 : vector<16x32xf32>
      %25 = arith.mulf %24, %24 : vector<16x32xf32>
      %cst_18 = arith.constant dense<0.000000e+00> : vector<16xf32>
      %26 = vector.multi_reduction <add>, %25, %cst_18 [1] : vector<16x32xf32> to vector<16xf32>
      %27 = vector.shape_cast %26 : vector<16xf32> to vector<16x1xf32>
      %cst_19 = arith.constant 3.200000e+01 : f32
      %28 = vector.broadcast %cst_19 : f32 to vector<16x1xf32>
      %29 = arith.divf %27, %28 : vector<16x1xf32>
      %30 = vector.broadcast %22 : vector<16x1xf32> to vector<16x32xf32>
      %31 = arith.subf %18, %30 : vector<16x32xf32>
      %cst_20 = arith.constant 9.99999974E-6 : f32
      %32 = vector.broadcast %cst_20 : f32 to vector<16x1xf32>
      %33 = arith.addf %29, %32 : vector<16x1xf32>
      %34 = math.rsqrt %33 : vector<16x1xf32>
      %35 = vector.broadcast %34 : vector<16x1xf32> to vector<16x32xf32>
      %36 = arith.mulf %31, %35 : vector<16x32xf32>
      %c0_21 = arith.constant 0 : index
      %c0_22 = arith.constant 0 : index
      %37 = vector.load %arg6[%c0_21, %c0_22] : memref<1x32xf32, #tpu.memory_space<vmem>>, vector<1x32xf32>
      %38 = vector.broadcast %37 : vector<1x32xf32> to vector<16x32xf32>
      %39 = arith.mulf %36, %38 : vector<16x32xf32>
      %c0_23 = arith.constant 0 : index
      %c0_24 = arith.constant 0 : index
      %40 = vector.load %arg7[%c0_23, %c0_24] : memref<1x32xf32, #tpu.memory_space<vmem>>, vector<1x32xf32>
      %41 = vector.broadcast %40 : vector<1x32xf32> to vector<16x32xf32>
      %42 = arith.addf %39, %41 : vector<16x32xf32>
      %43 = arith.truncf %42 : vector<16x32xf32> to vector<16x32xbf16>
      %c0_25 = arith.constant 0 : index
      %c0_26 = arith.constant 0 : index
      %44 = vector.load %arg8[%c0_25, %c0_26] : memref<16x32xbf16, #tpu.memory_space<vmem>>, vector<16x32xbf16>
      tpu.vector_store %arg8[%c0_25, %c0_26], %43 {strides = array<i32>} : memref<16x32xbf16, #tpu.memory_space<vmem>>, vector<16x32xbf16>,
    } else {
    }
    return
  }
  func.func @transform_0(%arg0: i32, %arg1: i32) -> (i32, i32) {
    %c0_i32 = arith.constant 0 : i32
    return %arg0, %arg1 : i32, i32
  }
  func.func @transform_1(%arg0: i32, %arg1: i32) -> (i32, i32) {
    %c0_i32 = arith.constant 0 : i32
    %c0_i32_0 = arith.constant 0 : i32
    return %arg1, %c0_i32 : i32, i32
  }
  func.func @transform_2(%arg0: i32, %arg1: i32) -> (i32, i32) {
    %c0_i32 = arith.constant 0 : i32
    %c0_i32_0 = arith.constant 0 : i32
    %c0_i32_1 = arith.constant 0 : i32
    return %c0_i32, %c0_i32_0 : i32, i32
  }
  func.func @transform_3(%arg0: i32, %arg1: i32) -> (i32, i32) {
    %c0_i32 = arith.constant 0 : i32
    %c0_i32_0 = arith.constant 0 : i32
    return %arg0, %c0_i32 : i32, i32
  }
  func.func @transform_4(%arg0: i32, %arg1: i32) -> (i32, i32) {
    %c0_i32 = arith.constant 0 : i32
    %c0_i32_0 = arith.constant 0 : i32
    %c0_i32_1 = arith.constant 0 : i32
    return %c0_i32, %c0_i32_0 : i32, i32
  }
  func.func @transform_5(%arg0: i32, %arg1: i32) -> (i32, i32) {
    %c0_i32 = arith.constant 0 : i32
    %c0_i32_0 = arith.constant 0 : i32
    %c0_i32_1 = arith.constant 0 : i32
    return %c0_i32, %c0_i32_0 : i32, i32
  }
  func.func @transform_6(%arg0: i32, %arg1: i32) -> (i32, i32) {
    %c0_i32 = arith.constant 0 : i32
    %c0_i32_0 = arith.constant 0 : i32
    return %arg0, %c0_i32 : i32, i32
  }
}

module attributes {stable_mosaic.version = 11 : i64} {
  func.func @_flash_attn_kernel(%arg0: i32, %arg1: i32, %arg2: i32, %arg3: i32, %arg4: memref<1x4x8x8xbf16, #tpu.memory_space<vmem>>, %arg5: memref<1x4x8x8xbf16, #tpu.memory_space<vmem>>, %arg6: memref<1x4x8x8xbf16, #tpu.memory_space<vmem>>, %arg7: memref<1x8x8xf32, #tpu.memory_space<vmem>>, %arg8: memref<1x4x8x8xbf16, #tpu.memory_space<vmem>>, %arg9: memref<4x8x1xf32, #tpu.memory_space<vmem>>, %arg10: memref<4x8x1xf32, #tpu.memory_space<vmem>>, %arg11: memref<4x8x8xf32, #tpu.memory_space<vmem>>) attributes {dimension_semantics = [#tpu.dimension_semantics<parallel>, #tpu.dimension_semantics<parallel>, #tpu.dimension_semantics<parallel>, #tpu.dimension_semantics<arbitrary>], iteration_bounds = array<i64: 2, 1, 1, 1>, scalar_prefetch = 0 : i64, scratch_operands = 3 : i64, tpu.core_type = #tpu.core_type<tc>, window_params = [{transform_indices = @transform_0, window_bounds = array<i64: 1, 4, 8, 8>}, {transform_indices = @transform_1, window_bounds = array<i64: 1, 4, 8, 8>}, {transform_indices = @transform_2, window_bounds = array<i64: 1, 4, 8, 8>}, {transform_indices = @transform_3, window_bounds = array<i64: 1, 8, 8>}, {transform_indices = @transform_4, window_bounds = array<i64: 1, 4, 8, 8>}]} {
    %c0_i32 = arith.constant 0 : i32
    %0 = arith.cmpi eq, %arg3, %c0_i32 : i32
    %1 = arith.extui %0 : i1 to i32
    %c0_i32_0 = arith.constant 0 : i32
    %2 = arith.cmpi ne, %1, %c0_i32_0 : i32
    scf.if %2 {
      %cst_38 = arith.constant 0xFF800000 : f32
      %39 = vector.broadcast %cst_38 : f32 to vector<4x8x1xf32>
      %c0_39 = arith.constant 0 : index
      %c0_40 = arith.constant 0 : index
      %c0_41 = arith.constant 0 : index
      %40 = vector.load %arg9[%c0_39, %c0_40, %c0_41] : memref<4x8x1xf32, #tpu.memory_space<vmem>>, vector<4x8x1xf32>
      tpu.vector_store %arg9[%c0_39, %c0_40, %c0_41], %39 {strides = array<i32>} : memref<4x8x1xf32, #tpu.memory_space<vmem>>, vector<4x8x1xf32>,
      %cst_42 = arith.constant 0.000000e+00 : f32
      %41 = vector.broadcast %cst_42 : f32 to vector<4x8x1xf32>
      %c0_43 = arith.constant 0 : index
      %c0_44 = arith.constant 0 : index
      %c0_45 = arith.constant 0 : index
      %42 = vector.load %arg10[%c0_43, %c0_44, %c0_45] : memref<4x8x1xf32, #tpu.memory_space<vmem>>, vector<4x8x1xf32>
      tpu.vector_store %arg10[%c0_43, %c0_44, %c0_45], %41 {strides = array<i32>} : memref<4x8x1xf32, #tpu.memory_space<vmem>>, vector<4x8x1xf32>,
      %cst_46 = arith.constant 0.000000e+00 : f32
      %43 = vector.broadcast %cst_46 : f32 to vector<4x8x8xf32>
      %c0_47 = arith.constant 0 : index
      %c0_48 = arith.constant 0 : index
      %c0_49 = arith.constant 0 : index
      %44 = vector.load %arg11[%c0_47, %c0_48, %c0_49] : memref<4x8x8xf32, #tpu.memory_space<vmem>>, vector<4x8x8xf32>
      tpu.vector_store %arg11[%c0_47, %c0_48, %c0_49], %43 {strides = array<i32>} : memref<4x8x8xf32, #tpu.memory_space<vmem>>, vector<4x8x8xf32>,
    } else {
    }
    %c0 = arith.constant 0 : index
    %c0_1 = arith.constant 0 : index
    %c0_2 = arith.constant 0 : index
    %c0_3 = arith.constant 0 : index
    %3 = vector.load %arg4[%c0, %c0_1, %c0_2, %c0_3] : memref<1x4x8x8xbf16, #tpu.memory_space<vmem>>, vector<1x4x8x8xbf16>
    %4 = vector.shape_cast %3 : vector<1x4x8x8xbf16> to vector<4x8x8xbf16>
    %c0_4 = arith.constant 0 : index
    %c0_5 = arith.constant 0 : index
    %c0_6 = arith.constant 0 : index
    %c0_7 = arith.constant 0 : index
    %5 = vector.load %arg5[%c0_4, %c0_5, %c0_6, %c0_7] : memref<1x4x8x8xbf16, #tpu.memory_space<vmem>>, vector<1x4x8x8xbf16>
    %6 = vector.shape_cast %5 : vector<1x4x8x8xbf16> to vector<4x8x8xbf16>
    %c0_8 = arith.constant 0 : index
    %c0_9 = arith.constant 0 : index
    %c0_10 = arith.constant 0 : index
    %c0_11 = arith.constant 0 : index
    %7 = vector.load %arg6[%c0_8, %c0_9, %c0_10, %c0_11] : memref<1x4x8x8xbf16, #tpu.memory_space<vmem>>, vector<1x4x8x8xbf16>
    %8 = vector.shape_cast %7 : vector<1x4x8x8xbf16> to vector<4x8x8xbf16>
    %c0_12 = arith.constant 0 : index
    %c0_13 = arith.constant 0 : index
    %c0_14 = arith.constant 0 : index
    %9 = vector.load %arg7[%c0_12, %c0_13, %c0_14] : memref<1x8x8xf32, #tpu.memory_space<vmem>>, vector<1x8x8xf32>
    "tpu.trace_start"() <{level = 10 : i32, message = "hqd,hkd->hqk"}> : () -> ()
    %cst = arith.constant dense<0.000000e+00> : vector<4x8x8xf32>
    %10 = tpu.matmul %4, %6, %cst {dimension_numbers = #tpu.dot_dimension_numbers<[2], [2], [1], [1], [0, 0, 0, 1, 1, 1], [0], [0]>} : vector<4x8x8xbf16>, vector<4x8x8xbf16>, vector<4x8x8xf32> -> vector<4x8x8xf32>
    "tpu.trace_stop"() : () -> ()
    %11 = vector.broadcast %9 : vector<1x8x8xf32> to vector<4x8x8xf32>
    %12 = arith.addf %10, %11 : vector<4x8x8xf32>
    %c0_15 = arith.constant 0 : index
    %c0_16 = arith.constant 0 : index
    %c0_17 = arith.constant 0 : index
    %13 = vector.load %arg9[%c0_15, %c0_16, %c0_17] : memref<4x8x1xf32, #tpu.memory_space<vmem>>, vector<4x8x1xf32>
    %cst_18 = arith.constant dense<0xFF800000> : vector<4x8xf32>
    %14 = vector.multi_reduction <maximumf>, %12, %cst_18 [2] : vector<4x8x8xf32> to vector<4x8xf32>
    %15 = vector.shape_cast %14 : vector<4x8xf32> to vector<4x8x1xf32>
    %16 = arith.maximumf %13, %15 : vector<4x8x1xf32>
    %17 = arith.subf %13, %16 : vector<4x8x1xf32>
    %18 = math.exp %17 : vector<4x8x1xf32>
    %19 = vector.broadcast %16 : vector<4x8x1xf32> to vector<4x8x8xf32>
    %20 = arith.subf %12, %19 : vector<4x8x8xf32>
    %21 = math.exp %20 : vector<4x8x8xf32>
    %c0_19 = arith.constant 0 : index
    %c0_20 = arith.constant 0 : index
    %c0_21 = arith.constant 0 : index
    %22 = vector.load %arg10[%c0_19, %c0_20, %c0_21] : memref<4x8x1xf32, #tpu.memory_space<vmem>>, vector<4x8x1xf32>
    %23 = arith.mulf %18, %22 : vector<4x8x1xf32>
    %cst_22 = arith.constant dense<0.000000e+00> : vector<4x8xf32>
    %24 = vector.multi_reduction <add>, %21, %cst_22 [2] : vector<4x8x8xf32> to vector<4x8xf32>
    %25 = vector.shape_cast %24 : vector<4x8xf32> to vector<4x8x1xf32>
    %26 = arith.addf %23, %25 : vector<4x8x1xf32>
    %c0_23 = arith.constant 0 : index
    %c0_24 = arith.constant 0 : index
    %c0_25 = arith.constant 0 : index
    %27 = vector.load %arg10[%c0_23, %c0_24, %c0_25] : memref<4x8x1xf32, #tpu.memory_space<vmem>>, vector<4x8x1xf32>
    tpu.vector_store %arg10[%c0_23, %c0_24, %c0_25], %26 {strides = array<i32>} : memref<4x8x1xf32, #tpu.memory_space<vmem>>, vector<4x8x1xf32>,
    %c0_26 = arith.constant 0 : index
    %c0_27 = arith.constant 0 : index
    %c0_28 = arith.constant 0 : index
    %28 = vector.load %arg11[%c0_26, %c0_27, %c0_28] : memref<4x8x8xf32, #tpu.memory_space<vmem>>, vector<4x8x8xf32>
    %29 = vector.broadcast %18 : vector<4x8x1xf32> to vector<4x8x8xf32>
    %30 = arith.mulf %29, %28 : vector<4x8x8xf32>
    %31 = arith.truncf %21 : vector<4x8x8xf32> to vector<4x8x8xbf16>
    "tpu.trace_start"() <{level = 10 : i32, message = "hqk,hkd->hqd"}> : () -> ()
    %cst_29 = arith.constant dense<0.000000e+00> : vector<4x8x8xf32>
    %32 = tpu.matmul %31, %8, %cst_29 {dimension_numbers = #tpu.dot_dimension_numbers<[2], [1], [1], [2], [0, 0, 0, 1, 1, 2], [0], [0]>} : vector<4x8x8xbf16>, vector<4x8x8xbf16>, vector<4x8x8xf32> -> vector<4x8x8xf32>
    "tpu.trace_stop"() : () -> ()
    %33 = arith.addf %30, %32 : vector<4x8x8xf32>
    %c0_30 = arith.constant 0 : index
    %c0_31 = arith.constant 0 : index
    %c0_32 = arith.constant 0 : index
    %34 = vector.load %arg11[%c0_30, %c0_31, %c0_32] : memref<4x8x8xf32, #tpu.memory_space<vmem>>, vector<4x8x8xf32>
    tpu.vector_store %arg11[%c0_30, %c0_31, %c0_32], %33 {strides = array<i32>} : memref<4x8x8xf32, #tpu.memory_space<vmem>>, vector<4x8x8xf32>,
    %c0_33 = arith.constant 0 : index
    %c0_34 = arith.constant 0 : index
    %c0_35 = arith.constant 0 : index
    %35 = vector.load %arg9[%c0_33, %c0_34, %c0_35] : memref<4x8x1xf32, #tpu.memory_space<vmem>>, vector<4x8x1xf32>
    tpu.vector_store %arg9[%c0_33, %c0_34, %c0_35], %16 {strides = array<i32>} : memref<4x8x1xf32, #tpu.memory_space<vmem>>, vector<4x8x1xf32>,
    %c0_i32_36 = arith.constant 0 : i32
    %36 = arith.cmpi eq, %arg3, %c0_i32_36 : i32
    %37 = arith.extui %36 : i1 to i32
    %c0_i32_37 = arith.constant 0 : i32
    %38 = arith.cmpi ne, %37, %c0_i32_37 : i32
    scf.if %38 {
      %c0_38 = arith.constant 0 : index
      %c0_39 = arith.constant 0 : index
      %c0_40 = arith.constant 0 : index
      %39 = vector.load %arg10[%c0_38, %c0_39, %c0_40] : memref<4x8x1xf32, #tpu.memory_space<vmem>>, vector<4x8x1xf32>
      %40 = tpu.reciprocal %39 {approx = true} : vector<4x8x1xf32> -> vector<4x8x1xf32>
      %c0_41 = arith.constant 0 : index
      %c0_42 = arith.constant 0 : index
      %c0_43 = arith.constant 0 : index
      %41 = vector.load %arg11[%c0_41, %c0_42, %c0_43] : memref<4x8x8xf32, #tpu.memory_space<vmem>>, vector<4x8x8xf32>
      %42 = vector.broadcast %40 : vector<4x8x1xf32> to vector<4x8x8xf32>
      %43 = arith.mulf %41, %42 : vector<4x8x8xf32>
      %44 = arith.truncf %43 : vector<4x8x8xf32> to vector<4x8x8xbf16>
      %c0_44 = arith.constant 0 : index
      %c0_45 = arith.constant 0 : index
      %c0_46 = arith.constant 0 : index
      %c0_47 = arith.constant 0 : index
      %45 = vector.load %arg8[%c0_44, %c0_45, %c0_46, %c0_47] : memref<1x4x8x8xbf16, #tpu.memory_space<vmem>>, vector<1x4x8x8xbf16>
      %46 = vector.shape_cast %45 : vector<1x4x8x8xbf16> to vector<4x8x8xbf16>
      %47 = vector.shape_cast %44 : vector<4x8x8xbf16> to vector<1x4x8x8xbf16>
      tpu.vector_store %arg8[%c0_44, %c0_45, %c0_46, %c0_47], %47 {strides = array<i32>} : memref<1x4x8x8xbf16, #tpu.memory_space<vmem>>, vector<1x4x8x8xbf16>,
    } else {
    }
    return
  }
  func.func @transform_0(%arg0: i32, %arg1: i32, %arg2: i32, %arg3: i32) -> (i32, i32, i32, i32) {
    %c0_i32 = arith.constant 0 : i32
    %c0_i32_0 = arith.constant 0 : i32
    return %arg0, %arg1, %arg2, %c0_i32 : i32, i32, i32, i32
  }
  func.func @transform_1(%arg0: i32, %arg1: i32, %arg2: i32, %arg3: i32) -> (i32, i32, i32, i32) {
    %c0_i32 = arith.constant 0 : i32
    %c0_i32_0 = arith.constant 0 : i32
    return %arg0, %arg1, %arg3, %c0_i32 : i32, i32, i32, i32
  }
  func.func @transform_2(%arg0: i32, %arg1: i32, %arg2: i32, %arg3: i32) -> (i32, i32, i32, i32) {
    %c0_i32 = arith.constant 0 : i32
    %c0_i32_0 = arith.constant 0 : i32
    return %arg0, %arg1, %arg3, %c0_i32 : i32, i32, i32, i32
  }
  func.func @transform_3(%arg0: i32, %arg1: i32, %arg2: i32, %arg3: i32) -> (i32, i32, i32) {
    %c1_i32 = arith.constant 1 : i32
    %0 = arith.muli %arg0, %c1_i32 : i32
    %c0_i32 = arith.constant 0 : i32
    return %0, %arg2, %arg3 : i32, i32, i32
  }
  func.func @transform_4(%arg0: i32, %arg1: i32, %arg2: i32, %arg3: i32) -> (i32, i32, i32, i32) {
    %c0_i32 = arith.constant 0 : i32
    %c0_i32_0 = arith.constant 0 : i32
    return %arg0, %arg1, %arg2, %c0_i32 : i32, i32, i32, i32
  }
}

module attributes {stable_mosaic.version = 11 : i64} {
  func.func @_linear_kernel(%arg0: i32, %arg1: i32, %arg2: i32, %arg3: memref<16x128xbf16, #tpu.memory_space<vmem>>, %arg4: memref<128x128xbf16, #tpu.memory_space<vmem>>, %arg5: memref<1x128xf32, #tpu.memory_space<vmem>>, %arg6: memref<16x128xbf16, #tpu.memory_space<vmem>>, %arg7: memref<16x128xf32, #tpu.memory_space<vmem>>) attributes {dimension_semantics = [#tpu.dimension_semantics<parallel>, #tpu.dimension_semantics<parallel>, #tpu.dimension_semantics<arbitrary>], iteration_bounds = array<i64: 1, 1, 1>, scalar_prefetch = 0 : i64, scratch_operands = 1 : i64, tpu.core_type = #tpu.core_type<tc>, window_params = [{transform_indices = @transform_0, window_bounds = array<i64: 16, 128>}, {transform_indices = @transform_1, window_bounds = array<i64: 128, 128>}, {transform_indices = @transform_2, window_bounds = array<i64: 1, 128>}, {transform_indices = @transform_3, window_bounds = array<i64: 16, 128>}]} {
    %c0_i32 = arith.constant 0 : i32
    %0 = arith.cmpi eq, %arg2, %c0_i32 : i32
    %1 = arith.extui %0 : i1 to i32
    %c0_i32_0 = arith.constant 0 : i32
    %2 = arith.cmpi ne, %1, %c0_i32_0 : i32
    scf.if %2 {
      %cst_10 = arith.constant 0.000000e+00 : f32
      %12 = vector.broadcast %cst_10 : f32 to vector<16x128xf32>
      %c0_11 = arith.constant 0 : index
      %c0_12 = arith.constant 0 : index
      %13 = vector.load %arg7[%c0_11, %c0_12] : memref<16x128xf32, #tpu.memory_space<vmem>>, vector<16x128xf32>
      tpu.vector_store %arg7[%c0_11, %c0_12], %12 {strides = array<i32>} : memref<16x128xf32, #tpu.memory_space<vmem>>, vector<16x128xf32>,
    } else {
    }
    %c0 = arith.constant 0 : index
    %c0_1 = arith.constant 0 : index
    %3 = vector.load %arg7[%c0, %c0_1] : memref<16x128xf32, #tpu.memory_space<vmem>>, vector<16x128xf32>
    %c0_2 = arith.constant 0 : index
    %c0_3 = arith.constant 0 : index
    %4 = vector.load %arg3[%c0_2, %c0_3] : memref<16x128xbf16, #tpu.memory_space<vmem>>, vector<16x128xbf16>
    %c0_4 = arith.constant 0 : index
    %c0_5 = arith.constant 0 : index
    %5 = vector.load %arg4[%c0_4, %c0_5] : memref<128x128xbf16, #tpu.memory_space<vmem>>, vector<128x128xbf16>
    %cst = arith.constant dense<0.000000e+00> : vector<16x128xf32>
    %6 = tpu.matmul %4, %5, %cst {dimension_numbers = #tpu.dot_dimension_numbers<[1], [0], [0], [1], [0, 0, 1, 1], [], []>} : vector<16x128xbf16>, vector<128x128xbf16>, vector<16x128xf32> -> vector<16x128xf32>
    %7 = arith.addf %3, %6 : vector<16x128xf32>
    %c0_6 = arith.constant 0 : index
    %c0_7 = arith.constant 0 : index
    %8 = vector.load %arg7[%c0_6, %c0_7] : memref<16x128xf32, #tpu.memory_space<vmem>>, vector<16x128xf32>
    tpu.vector_store %arg7[%c0_6, %c0_7], %7 {strides = array<i32>} : memref<16x128xf32, #tpu.memory_space<vmem>>, vector<16x128xf32>,
    %c0_i32_8 = arith.constant 0 : i32
    %9 = arith.cmpi eq, %arg2, %c0_i32_8 : i32
    %10 = arith.extui %9 : i1 to i32
    %c0_i32_9 = arith.constant 0 : i32
    %11 = arith.cmpi ne, %10, %c0_i32_9 : i32
    scf.if %11 {
      %c0_10 = arith.constant 0 : index
      %c0_11 = arith.constant 0 : index
      %12 = vector.load %arg7[%c0_10, %c0_11] : memref<16x128xf32, #tpu.memory_space<vmem>>, vector<16x128xf32>
      %c0_12 = arith.constant 0 : index
      %c0_13 = arith.constant 0 : index
      %13 = vector.load %arg5[%c0_12, %c0_13] : memref<1x128xf32, #tpu.memory_space<vmem>>, vector<1x128xf32>
      %14 = vector.broadcast %13 : vector<1x128xf32> to vector<16x128xf32>
      %15 = arith.addf %12, %14 : vector<16x128xf32>
      %cst_14 = arith.constant 0.000000e+00 : f32
      %16 = vector.broadcast %cst_14 : f32 to vector<16x128xf32>
      %17 = arith.maximumf %15, %16 : vector<16x128xf32>
      %18 = arith.truncf %17 : vector<16x128xf32> to vector<16x128xbf16>
      %c0_15 = arith.constant 0 : index
      %c0_16 = arith.constant 0 : index
      %19 = vector.load %arg6[%c0_15, %c0_16] : memref<16x128xbf16, #tpu.memory_space<vmem>>, vector<16x128xbf16>
      tpu.vector_store %arg6[%c0_15, %c0_16], %18 {strides = array<i32>} : memref<16x128xbf16, #tpu.memory_space<vmem>>, vector<16x128xbf16>,
    } else {
    }
    return
  }
  func.func @transform_0(%arg0: i32, %arg1: i32, %arg2: i32) -> (i32, i32) {
    %c0_i32 = arith.constant 0 : i32
    return %arg0, %arg2 : i32, i32
  }
  func.func @transform_1(%arg0: i32, %arg1: i32, %arg2: i32) -> (i32, i32) {
    %c0_i32 = arith.constant 0 : i32
    return %arg2, %arg1 : i32, i32
  }
  func.func @transform_2(%arg0: i32, %arg1: i32, %arg2: i32) -> (i32, i32) {
    %c0_i32 = arith.constant 0 : i32
    %c0_i32_0 = arith.constant 0 : i32
    return %c0_i32, %arg1 : i32, i32
  }
  func.func @transform_3(%arg0: i32, %arg1: i32, %arg2: i32) -> (i32, i32) {
    %c0_i32 = arith.constant 0 : i32
    return %arg0, %arg1 : i32, i32
  }
}

module attributes {stable_mosaic.version = 11 : i64} {
  func.func @_linear_kernel(%arg0: i32, %arg1: i32, %arg2: i32, %arg3: memref<16x128xbf16, #tpu.memory_space<vmem>>, %arg4: memref<128x128xbf16, #tpu.memory_space<vmem>>, %arg5: memref<1x128xf32, #tpu.memory_space<vmem>>, %arg6: memref<16x128xf32, #tpu.memory_space<vmem>>, %arg7: memref<16x128xf32, #tpu.memory_space<vmem>>) attributes {dimension_semantics = [#tpu.dimension_semantics<parallel>, #tpu.dimension_semantics<parallel>, #tpu.dimension_semantics<arbitrary>], iteration_bounds = array<i64: 1, 1, 1>, scalar_prefetch = 0 : i64, scratch_operands = 1 : i64, tpu.core_type = #tpu.core_type<tc>, window_params = [{transform_indices = @transform_0, window_bounds = array<i64: 16, 128>}, {transform_indices = @transform_1, window_bounds = array<i64: 128, 128>}, {transform_indices = @transform_2, window_bounds = array<i64: 1, 128>}, {transform_indices = @transform_3, window_bounds = array<i64: 16, 128>}]} {
    %c0_i32 = arith.constant 0 : i32
    %0 = arith.cmpi eq, %arg2, %c0_i32 : i32
    %1 = arith.extui %0 : i1 to i32
    %c0_i32_0 = arith.constant 0 : i32
    %2 = arith.cmpi ne, %1, %c0_i32_0 : i32
    scf.if %2 {
      %cst_10 = arith.constant 0.000000e+00 : f32
      %12 = vector.broadcast %cst_10 : f32 to vector<16x128xf32>
      %c0_11 = arith.constant 0 : index
      %c0_12 = arith.constant 0 : index
      %13 = vector.load %arg7[%c0_11, %c0_12] : memref<16x128xf32, #tpu.memory_space<vmem>>, vector<16x128xf32>
      tpu.vector_store %arg7[%c0_11, %c0_12], %12 {strides = array<i32>} : memref<16x128xf32, #tpu.memory_space<vmem>>, vector<16x128xf32>,
    } else {
    }
    %c0 = arith.constant 0 : index
    %c0_1 = arith.constant 0 : index
    %3 = vector.load %arg7[%c0, %c0_1] : memref<16x128xf32, #tpu.memory_space<vmem>>, vector<16x128xf32>
    %c0_2 = arith.constant 0 : index
    %c0_3 = arith.constant 0 : index
    %4 = vector.load %arg3[%c0_2, %c0_3] : memref<16x128xbf16, #tpu.memory_space<vmem>>, vector<16x128xbf16>
    %c0_4 = arith.constant 0 : index
    %c0_5 = arith.constant 0 : index
    %5 = vector.load %arg4[%c0_4, %c0_5] : memref<128x128xbf16, #tpu.memory_space<vmem>>, vector<128x128xbf16>
    %cst = arith.constant dense<0.000000e+00> : vector<16x128xf32>
    %6 = tpu.matmul %4, %5, %cst {dimension_numbers = #tpu.dot_dimension_numbers<[1], [0], [0], [1], [0, 0, 1, 1], [], []>} : vector<16x128xbf16>, vector<128x128xbf16>, vector<16x128xf32> -> vector<16x128xf32>
    %7 = arith.addf %3, %6 : vector<16x128xf32>
    %c0_6 = arith.constant 0 : index
    %c0_7 = arith.constant 0 : index
    %8 = vector.load %arg7[%c0_6, %c0_7] : memref<16x128xf32, #tpu.memory_space<vmem>>, vector<16x128xf32>
    tpu.vector_store %arg7[%c0_6, %c0_7], %7 {strides = array<i32>} : memref<16x128xf32, #tpu.memory_space<vmem>>, vector<16x128xf32>,
    %c0_i32_8 = arith.constant 0 : i32
    %9 = arith.cmpi eq, %arg2, %c0_i32_8 : i32
    %10 = arith.extui %9 : i1 to i32
    %c0_i32_9 = arith.constant 0 : i32
    %11 = arith.cmpi ne, %10, %c0_i32_9 : i32
    scf.if %11 {
      %c0_10 = arith.constant 0 : index
      %c0_11 = arith.constant 0 : index
      %12 = vector.load %arg7[%c0_10, %c0_11] : memref<16x128xf32, #tpu.memory_space<vmem>>, vector<16x128xf32>
      %c0_12 = arith.constant 0 : index
      %c0_13 = arith.constant 0 : index
      %13 = vector.load %arg5[%c0_12, %c0_13] : memref<1x128xf32, #tpu.memory_space<vmem>>, vector<1x128xf32>
      %14 = vector.broadcast %13 : vector<1x128xf32> to vector<16x128xf32>
      %15 = arith.addf %12, %14 : vector<16x128xf32>
      %c0_14 = arith.constant 0 : index
      %c0_15 = arith.constant 0 : index
      %16 = vector.load %arg6[%c0_14, %c0_15] : memref<16x128xf32, #tpu.memory_space<vmem>>, vector<16x128xf32>
      tpu.vector_store %arg6[%c0_14, %c0_15], %15 {strides = array<i32>} : memref<16x128xf32, #tpu.memory_space<vmem>>, vector<16x128xf32>,
    } else {
    }
    return
  }
  func.func @transform_0(%arg0: i32, %arg1: i32, %arg2: i32) -> (i32, i32) {
    %c0_i32 = arith.constant 0 : i32
    return %arg0, %arg2 : i32, i32
  }
  func.func @transform_1(%arg0: i32, %arg1: i32, %arg2: i32) -> (i32, i32) {
    %c0_i32 = arith.constant 0 : i32
    return %arg2, %arg1 : i32, i32
  }
  func.func @transform_2(%arg0: i32, %arg1: i32, %arg2: i32) -> (i32, i32) {
    %c0_i32 = arith.constant 0 : i32
    %c0_i32_0 = arith.constant 0 : i32
    return %c0_i32, %arg1 : i32, i32
  }
  func.func @transform_3(%arg0: i32, %arg1: i32, %arg2: i32) -> (i32, i32) {
    %c0_i32 = arith.constant 0 : i32
    return %arg0, %arg1 : i32, i32
  }
}

</mosaic_0001>

<bundles_post_ra>
// kernel: transformer_forward.39
= control target key start
LH: loop header
LB: loop body
LE: loop exit
PB: predicated region body
PF: predicated region fallthrough
CT: control target
= control target key end

     0   :  { %v227_v0 = vmov 0.0   ;;  %vm228_vm0 = vmmov 0   ;;  %s282_s1 = inlined_call_operand.vmem [shape: bf16[128,128], index: 1, kind: input, shape index: {}]   ;;  %s283_s0 = inlined_call_operand.vmem [shape: bf16[16,128], index: 0, kind: input, shape index: {}]   ;;  %s284_s2 = inlined_call_operand.vmem [shape: f32[1,128], index: 2, kind: input, shape index: {}]   ;;  %s285_s3 = inlined_call_operand.vmem [shape: bf16[16,128], index: 3, kind: output, shape index: {}]  }
   0x1   :  { %196 = vmatprep.subr.bf16.mxu0 %v227_v0  ;;  %v218_v1 = vld [vmem:[%s282_s1 + $0x38] sm:$0xff]   ;;  %212 = vmatprep.mubr.msk.bf16.mxu0 %vm228_vm0, %v227_v0  ;;  %v219_v2 = vld [vmem:[%s282_s1 + $0x30] sm:$0xff]   ;;  %v220_v3 = vld [vmem:[%s282_s1 + $0x28] sm:$0xff]  }
   0x2   :  { %197 = vmatpush3.bf16.msra.mxu0 %v218_v1  ;;  %v221_v4 = vld [vmem:[%s282_s1 + $0x20] sm:$0xff]   ;;  %v222_v5 = vld [vmem:[%s282_s1 + $0x18] sm:$0xff]   ;;  %v223_v6 = vld [vmem:[%s282_s1 + $0x10] sm:$0xff]  }
   0x3   :  { %198 = vmatprep.subr.bf16.mxu0 %v227_v0  ;;  %v224_v7 = vld [vmem:[%s282_s1 + $0x8] sm:$0xff]   ;;  %v225_v8 = vld [vmem:[%s282_s1] sm:$0xff]  }
   0x4   :  { %v226_v9 = vld [vmem:[%s283_s0] sm:$0xff]  }
   0x5   :  { %v177_v11 = vld [vmem:[%s284_s2] ss:$0 sm:$0xff] }
   0x6   :  { %199 = vmatpush3.bf16.msra.mxu0 %v219_v2 }
   0x7   :  { %200 = vmatprep.subr.bf16.mxu0 %v227_v0 }
   0xa   :  { %201 = vmatpush3.bf16.msra.mxu0 %v220_v3 }
   0xb   :  { %202 = vmatprep.subr.bf16.mxu0 %v227_v0 }
   0xe   :  { %203 = vmatpush3.bf16.msra.mxu0 %v221_v4 }
   0xf   :  { %204 = vmatprep.subr.bf16.mxu0 %v227_v0 }
  0x12   :  { %205 = vmatpush3.bf16.msra.mxu0 %v222_v5 }
  0x13   :  { %206 = vmatprep.subr.bf16.mxu0 %v227_v0 }
  0x16   :  { %207 = vmatpush3.bf16.msra.mxu0 %v223_v6 }
  0x17   :  { %208 = vmatprep.subr.bf16.mxu0 %v227_v0 }
  0x1a   :  { %209 = vmatpush3.bf16.msra.mxu0 %v224_v7 }
  0x1b   :  { %210 = vmatprep.subr.bf16.mxu0 %v227_v0 }
  0x1e   :  { %211 = vmatpush3.bf16.msra.mxu0 %v225_v8 }
  0x21   :  { %213 = vmatmul.mubr.bf16.vlgmr.msra.gmra.mxu0 %v226_v9 }
  0xe1   :  { %v129_v10 = vpop.f32.mrf.mxu0 }
  0xe2   :  { %v152_v14 = vadd.f32 %v177_v11, %v129_v10 }
  0xe3   :  { %v214_v12 = vpop.f32.mrf.mxu0 }
  0xe5   :  { %v132_v13 = vpop.f32.mrf.mxu0 }
  0xe6   :  { %v153_v15 = vadd.f32 %v177_v11, %v132_v13 }
  0xe7   :  { %v215_v16 = vpop.f32.mrf.mxu0 }
  0xe8   :  { %v185_v17 = vpack.c.bf16 %v153_v15, %v152_v14 }
  0xea   :  { %186 = vst [vmem:[%s285_s3] sm:$0xff] %v185_v17  }

// kernel: transformer_forward.41
= control target key start
LH: loop header
LB: loop body
LE: loop exit
PB: predicated region body
PF: predicated region fallthrough
CT: control target
= control target key end

     0   :  { %vm28_vm0 = vcmask 261120   ;;  %v295_v0 = vmov 0.0   ;;  %vm296_vm1 = vmmov 0   ;;  %vm224_vm2 = vcmask 257024   ;;  %s385_s1 = inlined_call_operand.vmem [shape: bf16[128,32], index: 1, kind: input, shape index: {}]   ;;  %s386_s0 = inlined_call_operand.vmem [shape: bf16[16,128], index: 0, kind: input, shape index: {}]   ;;  %s387_s3 = inlined_call_operand.vmem [shape: bf16[16,32], index: 3, kind: input, shape index: {}]   ;;  %s388_s2 = inlined_call_operand.vmem [shape: f32[1,32], index: 2, kind: input, shape index: {}]   ;;  %s389_s4 = inlined_call_operand.vmem [shape: f32[1,32], index: 4, kind: input, shape index: {}]   ;;  %s390_s5 = inlined_call_operand.vmem [shape: f32[1,32], index: 5, kind: input, shape index: {}]   ;;  %s391_s6 = inlined_call_operand.vmem [shape: bf16[16,32], index: 6, kind: output, shape index: {}]  }
   0x1   :  { %260 = vmatprep.subr.bf16.mxu0 %v295_v0  ;;  %v282_v1 = vld [vmem:[%s385_s1 + $0x38] sm:$0xff]   ;;  %276 = vmatprep.mubr.msk.bf16.mxu0 %vm296_vm1, %v295_v0  ;;  %29 = vst.msk [vmem:[#allocation2] sm:$0xff] %vm28_vm0, %v295_v0  ;;  %30 = vst.msk [vmem:[#allocation2 + $0x8] sm:$0xff] %vm28_vm0, %v295_v0  ;;  %v283_v2 = vld [vmem:[%s385_s1 + $0x30] sm:$0xff]  }
   0x2   :  { %261 = vmatpush3.bf16.msra.mxu0 %v282_v1  ;;  %v284_v3 = vld [vmem:[%s385_s1 + $0x28] sm:$0xff]   ;;  %v285_v4 = vld [vmem:[%s385_s1 + $0x20] sm:$0xff]   ;;  %v286_v5 = vld [vmem:[%s385_s1 + $0x18] sm:$0xff]  }
   0x3   :  { %262 = vmatprep.subr.bf16.mxu0 %v295_v0  ;;  %v287_v6 = vld [vmem:[%s385_s1 + $0x10] sm:$0xff]   ;;  %v288_v7 = vld [vmem:[%s385_s1 + $0x8] sm:$0xff]   ;;  %v289_v8 = vld [vmem:[%s385_s1] sm:$0xff]  }
   0x4   :  { %v290_v9 = vld [vmem:[%s386_s0] sm:$0xff]  }
   0x5   :  { %v248_v18 = vld [vmem:[%s387_s3] sm:$0xff]  }
   0x6   :  { %263 = vmatpush3.bf16.msra.mxu0 %v283_v2  ;;  %v240_v19 = vld [vmem:[%s388_s2] ss:$0 sm:$0xff]  ;;  %v249_v20 = vunpack.c.l.bf16 %v248_v18  ;;  %v250_v24 = vunpack.c.h.bf16 %v248_v18 }
   0x7   :  { %264 = vmatprep.subr.bf16.mxu0 %v295_v0  ;;  %v241_v47 = vld [vmem:[%s389_s4] ss:$0 sm:$0xff] }
   0x8   :  { %v31_v10 = vld [vmem:[#allocation2] sm:$0xff]  ;;  %v32_v14 = vld [vmem:[#allocation2 + $0x8] sm:$0xff] }
   0x9   :  { %v242_v49 = vld [vmem:[%s390_s5] ss:$0 sm:$0xff] }
   0xa   :  { %265 = vmatpush3.bf16.msra.mxu0 %v284_v3 }
   0xb   :  { %266 = vmatprep.subr.bf16.mxu0 %v295_v0 }
   0xe   :  { %267 = vmatpush3.bf16.msra.mxu0 %v285_v4 }
   0xf   :  { %268 = vmatprep.subr.bf16.mxu0 %v295_v0 }
  0x12   :  { %269 = vmatpush3.bf16.msra.mxu0 %v286_v5 }
  0x13   :  { %270 = vmatprep.subr.bf16.mxu0 %v295_v0 }
  0x16   :  { %271 = vmatpush3.bf16.msra.mxu0 %v287_v6 }
  0x17   :  { %272 = vmatprep.subr.bf16.mxu0 %v295_v0 }
  0x1a   :  { %273 = vmatpush3.bf16.msra.mxu0 %v288_v7 }
  0x1b   :  { %274 = vmatprep.subr.bf16.mxu0 %v295_v0 }
  0x1e   :  { %275 = vmatpush3.bf16.msra.mxu0 %v289_v8 }
  0x21   :  { %277 = vmatmul.mubr.bf16.vlgmr.msra.gmra.mxu0 %v290_v9 }
  0xe1   :  { %v139_v11 = vpop.f32.mrf.mxu0 }
  0xe2   :  { %v146_v12 = vadd.f32 %v139_v11, %v31_v10 }
  0xe3   :  { %v278_v13 = vpop.f32.mrf.mxu0 }
  0xe4   :  { %149 = vst.msk [vmem:[#allocation2] sm:$0xff] %vm28_vm0, %v146_v12 }
  0xe5   :  { %v142_v15 = vpop.f32.mrf.mxu0 }
  0xe6   :  { %v147_v16 = vadd.f32 %v142_v15, %v32_v14 }
  0xe7   :  { %v279_v17 = vpop.f32.mrf.mxu0 }
  0xe8   :  { %150 = vst.msk [vmem:[#allocation2 + $0x8] sm:$0xff] %vm28_vm0, %v147_v16 }
  0xeb   :  { %v154_v21 = vld [vmem:[#allocation2] sm:$0xff] }
  0xec   :  { %v163_v22 = vadd.f32 %v240_v19, %v154_v21 }
  0xee   :  { %v169_v23 = vadd.f32 %v249_v20, %v163_v22 }
  0xef   :  { %v155_v25 = vld [vmem:[#allocation2 + $0x8] sm:$0xff] }
  0xf0   :  { %v171_v26 = vsel %vm28_vm0, %v169_v23, 0.0  ;;  %v164_v27 = vadd.f32 %v240_v19, %v155_v25 }
  0xf1   :  { %172 = vadd.xlane.f32.xlu0 %v171_v26 }
  0xf2   :  { %v170_v28 = vadd.f32 %v250_v24, %v164_v27 }
  0xf4   :  { %v174_v29 = vsel %vm28_vm0, %v170_v28, 0.0 }
  0xf5   :  { %175 = vadd.xlane.f32.xlu0 %v174_v29 }
 0x17a   :  { %v173_v30 = vpop.xlane.xlu0 %172 }
 0x17b   :  { %v178_v31 = vmul.f32 0.03125, %v173_v30 }
 0x17d   :  { %v180_v32 = vsub.f32 %v169_v23, %v178_v31 }
 0x17e   :  { %v176_v33 = vpop.xlane.xlu0 %175 }
 0x17f   :  { %v179_v34 = vmul.f32 0.03125, %v176_v33  ;;  %v182_v35 = vmul.f32 %v180_v32, %v180_v32 }
 0x181   :  { %v181_v36 = vsub.f32 %v170_v28, %v179_v34  ;;  %v184_v37 = vsel %vm28_vm0, %v182_v35, 0.0 }
 0x182   :  { %185 = vadd.xlane.f32.xlu1 %v184_v37 }
 0x183   :  { %v183_v38 = vmul.f32 %v181_v36, %v181_v36 }
 0x185   :  { %v187_v39 = vsel %vm28_vm0, %v183_v38, 0.0 }
 0x186   :  { %188 = vadd.xlane.f32.xlu1 %v187_v39 }
 0x20b   :  { %v186_v40 = vpop.xlane.xlu1 %185 }
 0x20c   :  { %v190_v41 = vmul.f32 0.03125, %v186_v40 }
 0x20e   :  { %v192_v42 = vadd.f32 1e-05, %v190_v41 }
 0x20f   :  { %v189_v43 = vpop.xlane.xlu1 %188 }
 0x210   :  { %291 = vrsqrt.f32 %v192_v42  ;;  %v191_v44 = vmul.f32 0.03125, %v189_v43 }
 0x212   :  { %v193_v45 = vadd.f32 1e-05, %v191_v44 }
 0x214   :  { %293 = vrsqrt.f32 %v193_v45 }
 0x21d   :  { %v292_v46 = vpop.eup %291 }
 0x21e   :  { %v196_v48 = vmul.f32 %v292_v46, %v180_v32 }
 0x220   :  { %v205_v50 = vmul.f32 %v241_v47, %v196_v48 }
 0x221   :  { %v294_v51 = vpop.eup %293 }
 0x222   :  { %v214_v52 = vadd.f32 %v242_v49, %v205_v50  ;;  %v197_v53 = vmul.f32 %v294_v51, %v181_v36 }
 0x224   :  { %v245_v54 = vpack.c.bf16 %v214_v52, %v214_v52  ;;  %v206_v55 = vmul.f32 %v241_v47, %v197_v53 }
 0x226   :  { %225 = vst.msk [vmem:[%s391_s6] sm:$0xf] %vm224_vm2, %v245_v54  ;;  %v215_v56 = vadd.f32 %v242_v49, %v206_v55 }
 0x228   :  { %v246_v57 = vpack.c.bf16 %v215_v56, %v215_v56 }
 0x22a   :  { %226 = vst.msk [vmem:[%s391_s6 + $0x4] sm:$0xf] %vm224_vm2, %v246_v57 }

// kernel: transformer_forward.40
= control target key start
LH: loop header
LB: loop body
LE: loop exit
PB: predicated region body
PF: predicated region fallthrough
CT: control target
= control target key end

     0   :  { %s1344_s15 = smov 0   ;;  %s1346_s16 = smov 0   ;;  %s1526_s0 = inlined_call_operand.vmem [shape: bf16[2,4,8,8], index: 0, kind: input, shape index: {}]   ;;  %s1527_s1 = inlined_call_operand.vmem [shape: bf16[2,4,8,8], index: 1, kind: input, shape index: {}]   ;;  %s1528_s2 = inlined_call_operand.vmem [shape: bf16[2,4,8,8], index: 2, kind: input, shape index: {}]   ;;  %s1529_s3 = inlined_call_operand.vmem [shape: f32[1,8,8], index: 3, kind: input, shape index: {}]   ;;  %s1530_s4 = inlined_call_operand.vmem [shape: bf16[2,4,8,8], index: 4, kind: output, shape index: {}]  }
   0x1   :  { %s1348_s17 = smov 0  }
   0x2 LB: > { %s40_s18 = sadd.s32 1, %s1309_s16  ;;  %p1150_p0 = scmp.ge.s32.totalorder %s1313_s17, 1  ;;  %s1313_s17 = sphi %s1348_s17, %s14_s17   ;;  %s1309_s16 = sphi %s1346_s16, %s1532_s16   ;;  %s1305_s15 = sphi %s1344_s15, %s1531_s15  }
   0x3   : > { %p42_p1 = scmp.ge.s32.totalorder %s40_s18, 2  ;;  %p262_p2 = scmp.lt.s32.totalorder %s1313_s17, 3 }
   0x5   : > { %s1534_s18 = smov (%p42_p1, %s40_s18), 0  ;;  %p263_p3 = pnand %p1150_p0, %p262_p2 }
   0x6   : > { %p334_p4 = scmp.lt.s32.totalorder (!%p263_p3), %s1305_s15, 1 }
   0x7   : > { %266 = sbr.rel (%p263_p3) target bundleno = 806 (0x326), region = 36 }
   0xc   : > { %vm406_vm0 = vcmask 64512   ;;  %v1315_v0 = vmov 0.0   ;;  %s1536_s15 = smov (!%p334_p4, %s1305_s15), 1  ;;  %vm1316_vm1 = vmmov 0   ;;  %vm397_vm2 = vcmask 7168   ;;  %v423_v14 = vld [vmem:[%s1529_s3] sm:$0xff] }
   0xd   : > { %1189 = vmatprep.subr.bf16.mxu0 %v1315_v0  ;;  %1195 = vmatprep.subr.bf16.mxu1 %v1315_v0  ;;  %407 = vst.msk [vmem:[#allocation4] sm:$0xff] %vm406_vm0, %v1315_v0  ;;  %408 = vst.msk [vmem:[#allocation4 + $0x8] sm:$0xff] %vm406_vm0, %v1315_v0  ;;  %s1376_s19 = sshll.u32 %s1536_s15, 4  ;;  %v1317_v13 = vmov -inf   ;;  %v1318_v39 = vmov 0   ;;  %vm737_vm3 = vcmask 1043456  }
   0xe   : > { %409 = vst.msk [vmem:[#allocation4 + $0x10] sm:$0xff] %vm406_vm0, %v1315_v0  ;;  %410 = vst.msk [vmem:[#allocation4 + $0x18] sm:$0xff] %vm406_vm0, %v1315_v0  ;;  %1191 = vmatprep.mubr.msk.bf16.mxu0 %vm1316_vm1, %v1315_v0  ;;  %1197 = vmatprep.mubr.msk.bf16.mxu1 %vm1316_vm1, %v1315_v0  ;;  %s357_s22 = scalar_lea.vmem %s1527_s1, %s1376_s19  ;;  %s344_s25 = scalar_lea.vmem %s1526_s0, %s1376_s19  ;;  %vm974_vm4 = vcmask 60416  }
   0xf   : > { %v415_v1 = vld [vmem:[%s357_s22] sm:$0xf]  ;;  %v416_v2 = vld [vmem:[%s357_s22 + $0x4] sm:$0xf]  ;;  %v417_v5 = vld [vmem:[%s357_s22 + $0x8] sm:$0xf]  ;;  %1265 = vset.pattern.permute.xlu0 %v1318_v39  ;;  %1266 = vset.pattern.permute.xlu1 %v1318_v39  ;;  %s370_s30 = scalar_lea.vmem %s1528_s2, %s1376_s19  ;;  %s390_s7 = scalar_lea.vmem %s1530_s4, %s1376_s19 }
  0x10   : > { %v429_v3 = vsel %vm406_vm0, %v415_v1, 0  ;;  %v475_v4 = vsel %vm406_vm0, %v416_v2, 0  ;;  %v418_v6 = vld [vmem:[%s357_s22 + $0xc] sm:$0xf]  ;;  %v411_v7 = vld [vmem:[%s344_s25] sm:$0xf] }
  0x11   : > { %1190 = vmatpush3.bf16.xpose.msra.mxu0 %v429_v3  ;;  %1196 = vmatpush3.bf16.xpose.msra.mxu1 %v475_v4  ;;  %v412_v8 = vld [vmem:[%s344_s25 + $0x4] sm:$0xf]  ;;  %v521_v9 = vsel %vm406_vm0, %v417_v5, 0  ;;  %v567_v10 = vsel %vm406_vm0, %v418_v6, 0  ;;  %v413_v11 = vld [vmem:[%s344_s25 + $0x8] sm:$0xf] }
  0x12   : > { %1201 = vmatprep.subr.bf16.mxu0 %v1315_v0  ;;  %1207 = vmatprep.subr.bf16.mxu1 %v1315_v0  ;;  %v414_v12 = vld [vmem:[%s344_s25 + $0xc] sm:$0xf]  ;;  %398 = vst.msk [vmem:[#allocation2] sm:$0xff] %vm397_vm2, %v1317_v13  ;;  %399 = vst.msk [vmem:[#allocation2 + $0x8] sm:$0xff] %vm397_vm2, %v1317_v13  ;;  %v419_v55 = vld [vmem:[%s370_s30] sm:$0xf] }
  0x13   : > { %400 = vst.msk [vmem:[#allocation2 + $0x10] sm:$0xff] %vm397_vm2, %v1317_v13  ;;  %401 = vst.msk [vmem:[#allocation2 + $0x18] sm:$0xff] %vm397_vm2, %v1317_v13  ;;  %v739_v57 = vsel %vm737_vm3, %v419_v55, 0  ;;  %v420_v58 = vld [vmem:[%s370_s30 + $0x4] sm:$0xf] }
  0x14   : > { %402 = vst.msk [vmem:[#allocation3] sm:$0xff] %vm397_vm2, %v1315_v0  ;;  %403 = vst.msk [vmem:[#allocation3 + $0x8] sm:$0xff] %vm397_vm2, %v1315_v0  ;;  %v785_v59 = vsel %vm737_vm3, %v420_v58, 0  ;;  %v421_v60 = vld [vmem:[%s370_s30 + $0x8] sm:$0xf] }
  0x15   : > { %404 = vst.msk [vmem:[#allocation3 + $0x10] sm:$0xff] %vm397_vm2, %v1315_v0  ;;  %405 = vst.msk [vmem:[#allocation3 + $0x18] sm:$0xff] %vm397_vm2, %v1315_v0  ;;  %v831_v61 = vsel %vm737_vm3, %v421_v60, 0  ;;  %v422_v62 = vld [vmem:[%s370_s30 + $0xc] sm:$0xf] }
  0x16   : > { %v877_v63 = vsel %vm737_vm3, %v422_v62, 0 }
  0x18   : > { %1192 = vmatmul.mubr.msk.bf16.vlgmr.msra.gmra.mxu0 %vm406_vm0, %v411_v7  ;;  %1198 = vmatmul.mubr.msk.bf16.vlgmr.msra.gmra.mxu1 %vm406_vm0, %v412_v8 }
  0x19   : > { %1202 = vmatpush3.bf16.xpose.msra.mxu0 %v521_v9  ;;  %1208 = vmatpush3.bf16.xpose.msra.mxu1 %v567_v10  ;;  %v1434_v40 = vld [vmem:[#allocation2] sm:$0xff]  ;;  %v1439_v43 = vld [vmem:[#allocation2 + $0x8] sm:$0xff] }
  0x1a   : > { %1203 = vmatprep.mubr.msk.bf16.mxu0 %vm1316_vm1, %v1315_v0  ;;  %1209 = vmatprep.mubr.msk.bf16.mxu1 %vm1316_vm1, %v1315_v0  ;;  %v1449_v47 = vld [vmem:[#allocation2 + $0x10] sm:$0xff]  ;;  %v1459_v51 = vld [vmem:[#allocation2 + $0x18] sm:$0xff] }
  0x1b   : > { %1213 = vmatprep.subr.bf16.mxu0 %v1315_v0  ;;  %1219 = vmatprep.subr.bf16.mxu1 %v1315_v0 }
  0x1c   : > { %v675_v39 = vld [vmem:[#allocation3 + $0x10] sm:$0xff] }
  0x20   : > { %1204 = vmatmul.mubr.msk.bf16.vlgmr.msra.gmra.mxu0 %vm406_vm0, %v413_v11  ;;  %1210 = vmatmul.mubr.msk.bf16.vlgmr.msra.gmra.mxu1 %vm406_vm0, %v414_v12 }
  0x21   : > { %1215 = vmatprep.mubr.msk.bf16.mxu0 %vm1316_vm1, %v1315_v0  ;;  %1221 = vmatprep.mubr.msk.bf16.mxu1 %vm1316_vm1, %v1315_v0 }
  0x22   : > { %1214 = vmatpush3.bf16.msra.mxu0 %v739_v57  ;;  %1220 = vmatpush3.bf16.msra.mxu1 %v785_v59  ;;  %v702_v57 = vld [vmem:[#allocation4] sm:$0xff]  ;;  %v703_v59 = vld [vmem:[#allocation4 + $0x8] sm:$0xff] }
  0x23   : > { %1225 = vmatprep.subr.bf16.mxu0 %v1315_v0  ;;  %1231 = vmatprep.subr.bf16.mxu1 %v1315_v0 }
  0xd8   : > { %v465_v15 = vpop.f32.mrf.mxu0  ;;  %v511_v16 = vpop.f32.mrf.mxu1 }
  0xd9   : > { %v1421_v17 = vadd.f32 %v465_v15, %v423_v14  ;;  %v1423_v18 = vadd.f32 %v511_v16, %v423_v14 }
  0xda   : > { %v1193_v19 = vpop.f32.mrf.mxu0  ;;  %v1199_v20 = vpop.f32.mrf.mxu1 }
  0xdb   : > { %v613_v21 = vsel %vm406_vm0, %v1421_v17, -inf  ;;  %v616_v24 = vsel %vm406_vm0, %v1423_v18, -inf }
  0xdc   : > { %v514_v22 = vpop.f32.mrf.mxu1  ;;  %614 = vmax.xlane.f32.xlu0 %v613_v21  ;;  %v468_v23 = vpop.f32.mrf.mxu0 }
  0xde   : > { %v1194_v25 = vpop.f32.mrf.mxu0  ;;  %v1200_v26 = vpop.f32.mrf.mxu1 }
  0xe0   : > { %v603_v27 = vpop.f32.mrf.mxu1  ;;  %617 = vmax.xlane.f32.xlu0 %v616_v24  ;;  %v557_v28 = vpop.f32.mrf.mxu0 }
  0xe1   : > { %v1429_v29 = vadd.f32 %v603_v27, %v423_v14  ;;  %v558_v30 = vadd.f32 %v557_v28, %v423_v14 }
  0xe2   : > { %v1205_v31 = vpop.f32.mrf.mxu0  ;;  %v1211_v32 = vpop.f32.mrf.mxu1 }
  0xe3   : > { %v619_v33 = vsel %vm406_vm0, %v558_v30, -inf  ;;  %v622_v36 = vsel %vm406_vm0, %v1429_v29, -inf  ;;  %v673_v32 = vld [vmem:[#allocation3] sm:$0xff] }
  0xe4   : > { %v606_v34 = vpop.f32.mrf.mxu1  ;;  %620 = vmax.xlane.f32.xlu1 %v619_v33  ;;  %v560_v35 = vpop.f32.mrf.mxu0 }
  0xe5   : > { %v674_v35 = vld [vmem:[#allocation3 + $0x8] sm:$0xff] }
  0xe6   : > { %v1206_v37 = vpop.f32.mrf.mxu0  ;;  %v1212_v38 = vpop.f32.mrf.mxu1 }
  0xe8   : > { %623 = vmax.xlane.f32.xlu1 %v622_v36 }
 0x165   : > { %v615_v41 = vpop.xlane.xlu0 %614 }
 0x166   : > { %v1437_v42 = vmax.f32 %v1434_v40, %v615_v41 }
 0x168   : > { %v629_v44 = vsub.f32 %v1434_v40, %v1437_v42  ;;  %927 = vst.msk [vmem:[#allocation2] sm:$0xff] %vm397_vm2, %v1437_v42  ;;  %643 = vperm.xlu0 %1265, %v1437_v42  }
 0x169   : > { %v618_v45 = vpop.xlane.xlu0 %617 }
 0x16a   : > { %v1447_v46 = vmax.f32 %v1439_v43, %v618_v45  ;;  %v633_v24 = vmul.f32 1.442695, %v629_v44 }
 0x16c   : > { %v630_v48 = vsub.f32 %v1439_v43, %v1447_v46  ;;  %928 = vst.msk [vmem:[#allocation2 + $0x8] sm:$0xff] %vm397_vm2, %v1447_v46  ;;  %648 = vperm.xlu1 %1266, %v1447_v46   ;;  %v676_v43 = vld [vmem:[#allocation3 + $0x18] sm:$0xff] }
 0x16d   : > { %v621_v49 = vpop.xlane.xlu1 %620 }
 0x16e   : > { %v1457_v50 = vmax.f32 %v1449_v47, %v621_v49  ;;  %v635_v22 = vmul.f32 1.442695, %v630_v48 }
 0x170   : > { %v631_v52 = vsub.f32 %v1449_v47, %v1457_v50  ;;  %929 = vst.msk [vmem:[#allocation2 + $0x10] sm:$0xff] %vm397_vm2, %v1457_v50  ;;  %653 = vperm.xlu1 %1266, %v1457_v50  }
 0x171   : > { %v624_v53 = vpop.xlane.xlu1 %623 }
 0x172   : > { %v1467_v54 = vmax.f32 %v1459_v51, %v624_v53 }
 0x174   : > { %v632_v56 = vsub.f32 %v1459_v51, %v1467_v54  ;;  %930 = vst.msk [vmem:[#allocation2 + $0x18] sm:$0xff] %vm397_vm2, %v1467_v54  ;;  %658 = vperm.xlu1 %1266, %v1467_v54  }
 0x176   : > { %v639_v27 = vmul.f32 1.442695, %v632_v56 }
 0x1e3   : > { %v644_v1 = vpop.permute.xlu0 %643 }
 0x1e4   : > { %v661_v2 = vsub.f32 %v1421_v17, %v644_v1 }
 0x1e6   : > { %v665_v3 = vmul.f32 1.442695, %v661_v2 }
 0x1e7   : > { %v649_v4 = vpop.permute.xlu1 %648 }
 0x1e8   : > { %1267 = vpow2.f32 %v665_v3  ;;  %v662_v5 = vsub.f32 %v1423_v18, %v649_v4  ;;  %v704_v3 = vld [vmem:[#allocation4 + $0x10] sm:$0xff] }
 0x1ea   : > { %v667_v6 = vmul.f32 1.442695, %v662_v5 }
 0x1eb   : > { %v654_v7 = vpop.permute.xlu1 %653 }
 0x1ec   : > { %1269 = vpow2.f32 %v667_v6  ;;  %v663_v8 = vsub.f32 %v558_v30, %v654_v7 }
 0x1ee   : > { %v669_v9 = vmul.f32 1.442695, %v663_v8 }
 0x1ef   : > { %v659_v10 = vpop.permute.xlu1 %658 }
 0x1f0   : > { %1271 = vpow2.f32 %v669_v9  ;;  %v664_v11 = vsub.f32 %v1429_v29, %v659_v10 }
 0x1f2   : > { %v671_v12 = vmul.f32 1.442695, %v664_v11  ;;  %v705_v11 = vld [vmem:[#allocation4 + $0x18] sm:$0xff] }
 0x1f4   : > { %1273 = vpow2.f32 %v671_v12 }
 0x1f5   : > { %v1268_v13 = vpop.eup %1267  ;;  %1275 = vpow2.f32 %v635_v22 }
 0x1f6   : > { %v681_v14 = vsel %vm406_vm0, %v1268_v13, 0.0  ;;  %v730_v15 = vpack.c.bf16 %v1268_v13, %v1268_v13  ;;  %1277 = vpow2.f32 %v633_v24 }
 0x1f7   : > { %682 = vadd.xlane.f32.xlu1 %v681_v14 }
 0x1f8   : > { %1216 = vmatmul.mubr.msk.bf16.vlgmr.msra.gmra.mxu0 %vm406_vm0, %v730_v15 }
 0x1f9   : > { %v1270_v16 = vpop.eup %1269  ;;  %1226 = vmatpush3.bf16.msra.mxu0 %v831_v61  ;;  %1227 = vmatprep.mubr.msk.bf16.mxu0 %vm1316_vm1, %v1315_v0 }
 0x1fa   : > { %v684_v17 = vsel %vm406_vm0, %v1270_v16, 0.0  ;;  %v731_v18 = vpack.c.bf16 %v1270_v16, %v1270_v16 }
 0x1fb   : > { %685 = vadd.xlane.f32.xlu0 %v684_v17 }
 0x1fc   : > { %1222 = vmatmul.mubr.msk.bf16.vlgmr.msra.gmra.mxu1 %vm406_vm0, %v731_v18 }
 0x1fd   : > { %v1272_v19 = vpop.eup %1271  ;;  %1232 = vmatpush3.bf16.msra.mxu1 %v877_v63  ;;  %1233 = vmatprep.mubr.msk.bf16.mxu1 %vm1316_vm1, %v1315_v0  ;;  %v637_v0 = vmul.f32 1.442695, %v631_v52 }
 0x1fe   : > { %v687_v20 = vsel %vm406_vm0, %v1272_v19, 0.0  ;;  %v732_v21 = vpack.c.bf16 %v1272_v19, %v1272_v19 }
 0x1ff   : > { %688 = vadd.xlane.f32.xlu1 %v687_v20  ;;  %1279 = vpow2.f32 %v637_v0 }
 0x200   : > { %1228 = vmatmul.mubr.msk.bf16.vlgmr.msra.gmra.mxu0 %vm406_vm0, %v732_v21  ;;  %1281 = vpow2.f32 %v639_v27 }
 0x201   : > { %v1274_v23 = vpop.eup %1273 }
 0x202   : > { %v690_v25 = vsel %vm406_vm0, %v1274_v23, 0.0  ;;  %v733_v26 = vpack.c.bf16 %v1274_v23, %v1274_v23  ;;  %v1276_v28 = vpop.eup %1275 }
 0x203   : > { %691 = vadd.xlane.f32.xlu1 %v690_v25  ;;  %v1278_v29 = vpop.eup %1277  ;;  %v678_v37 = vmul.f32 %v1276_v28, %v674_v35 }
 0x204   : > { %1234 = vmatmul.mubr.msk.bf16.vlgmr.msra.gmra.mxu1 %vm406_vm0, %v733_v26  ;;  %v677_v33 = vmul.f32 %v1278_v29, %v673_v32 }
 0x20c   : > { %v1280_v30 = vpop.eup %1279 }
 0x20d   : > { %v1282_v31 = vpop.eup %1281  ;;  %v679_v41 = vmul.f32 %v1280_v30, %v675_v39 }
 0x20e   : > { %v680_v46 = vmul.f32 %v1282_v31, %v676_v43 }
 0x211   : > { %713 = vperm.xlu0 %1265, %v1276_v28  }
 0x214   : > { %708 = vperm.xlu1 %1266, %v1278_v29  }
 0x218   : > { %718 = vperm.xlu1 %1266, %v1280_v30  }
 0x21c   : > { %723 = vperm.xlu1 %1266, %v1282_v31  }
 0x280   : > { %v683_v34 = vpop.xlane.xlu1 %682 }
 0x281   : > { %v693_v36 = vadd.f32 %v683_v34, %v677_v33 }
 0x283   : > { %698 = vst.msk [vmem:[#allocation3] sm:$0xff] %vm397_vm2, %v693_v36 }
 0x284   : > { %v686_v38 = vpop.xlane.xlu0 %685 }
 0x285   : > { %v694_v40 = vadd.f32 %v686_v38, %v678_v37 }
 0x287   : > { %699 = vst.msk [vmem:[#allocation3 + $0x8] sm:$0xff] %vm397_vm2, %v694_v40 }
 0x288   : > { %v689_v42 = vpop.xlane.xlu1 %688 }
 0x289   : > { %v695_v44 = vadd.f32 %v689_v42, %v679_v41 }
 0x28a   : > { %v934_v45 = vld [vmem:[#allocation3] sm:$0xff] }
 0x28b   : > { %700 = vst.msk [vmem:[#allocation3 + $0x10] sm:$0xff] %vm397_vm2, %v695_v44  ;;  %1283 = vrcp.f32 %v934_v45 }
 0x28c   : > { %v692_v47 = vpop.xlane.xlu1 %691  ;;  %v714_v60 = vpop.permute.xlu0 %713 }
 0x28d   : > { %v696_v48 = vadd.f32 %v692_v47, %v680_v46  ;;  %v727_v2 = vmul.f32 %v714_v60, %v703_v59 }
 0x28e   : > { %v935_v49 = vld [vmem:[#allocation3 + $0x8] sm:$0xff] }
 0x28f   : > { %701 = vst.msk [vmem:[#allocation3 + $0x18] sm:$0xff] %vm397_vm2, %v696_v48  ;;  %1285 = vrcp.f32 %v935_v49 }
 0x290   : > { %v709_v56 = vpop.permute.xlu1 %708 }
 0x291   : > { %v726_v58 = vmul.f32 %v709_v56, %v702_v57 }
 0x292   : > { %v936_v50 = vld [vmem:[#allocation3 + $0x10] sm:$0xff] }
 0x293   : > { %1287 = vrcp.f32 %v936_v50 }
 0x294   : > { %v719_v62 = vpop.permute.xlu1 %718 }
 0x295   : > { %v728_v9 = vmul.f32 %v719_v62, %v704_v3 }
 0x296   : > { %v937_v51 = vld [vmem:[#allocation3 + $0x18] sm:$0xff] }
 0x297   : > { %1289 = vrcp.f32 %v937_v51 }
 0x298   : > { %v1284_v52 = vpop.eup %1283  ;;  %v724_v10 = vpop.permute.xlu1 %723 }
 0x299   : > { %948 = vperm.xlu1 %1266, %v1284_v52   ;;  %v729_v17 = vmul.f32 %v724_v10, %v705_v11 }
 0x29c   : > { %v1286_v53 = vpop.eup %1285 }
 0x29d   : > { %953 = vperm.xlu0 %1265, %v1286_v53  }
 0x2a0   : > { %v1288_v54 = vpop.eup %1287 }
 0x2a1   : > { %958 = vperm.xlu1 %1266, %v1288_v54  }
 0x2a4   : > { %v1290_v55 = vpop.eup %1289 }
 0x2a5   : > { %963 = vperm.xlu0 %1265, %v1290_v55  }
 0x2b8   : > { %v775_v61 = vpop.f32.mrf.mxu0 }
 0x2b9   : > { %v919_v63 = vadd.f32 %v775_v61, %v726_v58 }
 0x2ba   : > { %v1217_v1 = vpop.f32.mrf.mxu0 }
 0x2bb   : > { %923 = vst.msk [vmem:[#allocation4] sm:$0xff] %vm406_vm0, %v919_v63 }
 0x2bc   : > { %v778_v4 = vpop.f32.mrf.mxu0  ;;  %v821_v5 = vpop.f32.mrf.mxu1 }
 0x2bd   : > { %v920_v6 = vadd.f32 %v821_v5, %v727_v2 }
 0x2be   : > { %v1218_v7 = vpop.f32.mrf.mxu0  ;;  %v1223_v8 = vpop.f32.mrf.mxu1 }
 0x2bf   : > { %924 = vst.msk [vmem:[#allocation4 + $0x8] sm:$0xff] %vm406_vm0, %v920_v6 }
 0x2c0   : > { %v824_v12 = vpop.f32.mrf.mxu1  ;;  %v867_v13 = vpop.f32.mrf.mxu0 }
 0x2c1   : > { %v921_v14 = vadd.f32 %v867_v13, %v728_v9 }
 0x2c2   : > { %v1224_v15 = vpop.f32.mrf.mxu1  ;;  %v1229_v16 = vpop.f32.mrf.mxu0  ;;  %v942_v26 = vld [vmem:[#allocation4] sm:$0xff] }
 0x2c3   : > { %925 = vst.msk [vmem:[#allocation4 + $0x10] sm:$0xff] %vm406_vm0, %v921_v14 }
 0x2c4   : > { %v870_v18 = vpop.f32.mrf.mxu0  ;;  %v913_v19 = vpop.f32.mrf.mxu1 }
 0x2c5   : > { %v922_v20 = vadd.f32 %v913_v19, %v729_v17 }
 0x2c6   : > { %v1230_v21 = vpop.f32.mrf.mxu0  ;;  %v1235_v22 = vpop.f32.mrf.mxu1  ;;  %v943_v28 = vld [vmem:[#allocation4 + $0x8] sm:$0xff] }
 0x2c7   : > { %926 = vst.msk [vmem:[#allocation4 + $0x18] sm:$0xff] %vm406_vm0, %v922_v20 }
 0x2c8   : > { %v916_v23 = vpop.f32.mrf.mxu1 }
 0x2ca   : > { %v1236_v24 = vpop.f32.mrf.mxu1  ;;  %v944_v33 = vld [vmem:[#allocation4 + $0x10] sm:$0xff] }
 0x2ce   : > { %v945_v37 = vld [vmem:[#allocation4 + $0x18] sm:$0xff] }
 0x314   : > { %v949_v25 = vpop.permute.xlu1 %948 }
 0x315   : > { %v966_v0 = vmul.f32 %v949_v25, %v942_v26 }
 0x317   : > { %v970_v27 = vpack.c.bf16 %v966_v0, %v966_v0 }
 0x318   : > { %v954_v29 = vpop.permute.xlu0 %953 }
 0x319   : > { %975 = vst.msk [vmem:[%s390_s7] sm:$0xf] %vm974_vm4, %v970_v27  ;;  %v967_v30 = vmul.f32 %v954_v29, %v943_v28 }
 0x31b   : > { %v971_v31 = vpack.c.bf16 %v967_v30, %v967_v30 }
 0x31c   : > { %v959_v32 = vpop.permute.xlu1 %958 }
 0x31d   : > { %976 = vst.msk [vmem:[%s390_s7 + $0x4] sm:$0xf] %vm974_vm4, %v971_v31  ;;  %v968_v34 = vmul.f32 %v959_v32, %v944_v33 }
 0x31f   : > { %v972_v35 = vpack.c.bf16 %v968_v34, %v968_v34 }
 0x320   : > { %v964_v36 = vpop.permute.xlu0 %963 }
 0x321   : > { %977 = vst.msk [vmem:[%s390_s7 + $0x8] sm:$0xf] %vm974_vm4, %v972_v35  ;;  %v969_v38 = vmul.f32 %v964_v36, %v945_v37 }
 0x323   : > { %v973_v39 = vpack.c.bf16 %v969_v38, %v969_v38 }
 0x325   : > { %978 = vst.msk [vmem:[%s390_s7 + $0xc] sm:$0xf] %vm974_vm4, %v973_v39 }
 0x326 PF: > { %s14_s17 = sadd.s32 1, %s1313_s17   ;;  %s1531_s15 = smov %s1309_s16 }
 0x327   : > { %p11_p5 = scmp.ge.s32.totalorder %s14_s17, 4   ;;  %s1532_s16 = smov %s1534_s18 }
 0x329   :  { %13 = sbr.rel (!%p11_p5) target bundleno = 2 (0x2), region = 83 }

// kernel: transformer_forward.32
= control target key start
LH: loop header
LB: loop body
LE: loop exit
PB: predicated region body
PF: predicated region fallthrough
CT: control target
= control target key end

     0   :  { %v229_v0 = vmov 0.0   ;;  %vm230_vm0 = vmmov 0   ;;  %s284_s1 = inlined_call_operand.vmem [shape: bf16[128,128], index: 1, kind: input, shape index: {}]   ;;  %s285_s0 = inlined_call_operand.vmem [shape: bf16[16,128], index: 0, kind: input, shape index: {}]   ;;  %s286_s2 = inlined_call_operand.vmem [shape: f32[1,128], index: 2, kind: input, shape index: {}]   ;;  %s287_s3 = inlined_call_operand.vmem [shape: bf16[16,128], index: 3, kind: output, shape index: {}]  }
   0x1   :  { %198 = vmatprep.subr.bf16.mxu0 %v229_v0  ;;  %v220_v1 = vld [vmem:[%s284_s1 + $0x38] sm:$0xff]   ;;  %214 = vmatprep.mubr.msk.bf16.mxu0 %vm230_vm0, %v229_v0  ;;  %v221_v2 = vld [vmem:[%s284_s1 + $0x30] sm:$0xff]   ;;  %v222_v3 = vld [vmem:[%s284_s1 + $0x28] sm:$0xff]  }
   0x2   :  { %199 = vmatpush3.bf16.msra.mxu0 %v220_v1  ;;  %v223_v4 = vld [vmem:[%s284_s1 + $0x20] sm:$0xff]   ;;  %v224_v5 = vld [vmem:[%s284_s1 + $0x18] sm:$0xff]   ;;  %v225_v6 = vld [vmem:[%s284_s1 + $0x10] sm:$0xff]  }
   0x3   :  { %200 = vmatprep.subr.bf16.mxu0 %v229_v0  ;;  %v226_v7 = vld [vmem:[%s284_s1 + $0x8] sm:$0xff]   ;;  %v227_v8 = vld [vmem:[%s284_s1] sm:$0xff]  }
   0x4   :  { %v228_v9 = vld [vmem:[%s285_s0] sm:$0xff]  }
   0x5   :  { %v179_v11 = vld [vmem:[%s286_s2] ss:$0 sm:$0xff] }
   0x6   :  { %201 = vmatpush3.bf16.msra.mxu0 %v221_v2 }
   0x7   :  { %202 = vmatprep.subr.bf16.mxu0 %v229_v0 }
   0xa   :  { %203 = vmatpush3.bf16.msra.mxu0 %v222_v3 }
   0xb   :  { %204 = vmatprep.subr.bf16.mxu0 %v229_v0 }
   0xe   :  { %205 = vmatpush3.bf16.msra.mxu0 %v223_v4 }
   0xf   :  { %206 = vmatprep.subr.bf16.mxu0 %v229_v0 }
  0x12   :  { %207 = vmatpush3.bf16.msra.mxu0 %v224_v5 }
  0x13   :  { %208 = vmatprep.subr.bf16.mxu0 %v229_v0 }
  0x16   :  { %209 = vmatpush3.bf16.msra.mxu0 %v225_v6 }
  0x17   :  { %210 = vmatprep.subr.bf16.mxu0 %v229_v0 }
  0x1a   :  { %211 = vmatpush3.bf16.msra.mxu0 %v226_v7 }
  0x1b   :  { %212 = vmatprep.subr.bf16.mxu0 %v229_v0 }
  0x1e   :  { %213 = vmatpush3.bf16.msra.mxu0 %v227_v8 }
  0x21   :  { %215 = vmatmul.mubr.bf16.vlgmr.msra.gmra.mxu0 %v228_v9 }
  0xe1   :  { %v129_v10 = vpop.f32.mrf.mxu0 }
  0xe2   :  { %v152_v13 = vadd.f32 %v179_v11, %v129_v10 }
  0xe3   :  { %v216_v12 = vpop.f32.mrf.mxu0 }
  0xe4   :  { %v154_v17 = vmax.f32 %v152_v13, 0.0 }
  0xe5   :  { %v132_v14 = vpop.f32.mrf.mxu0 }
  0xe6   :  { %v153_v15 = vadd.f32 %v179_v11, %v132_v14 }
  0xe7   :  { %v217_v16 = vpop.f32.mrf.mxu0 }
  0xe8   :  { %v155_v18 = vmax.f32 %v153_v15, 0.0 }
  0xea   :  { %v187_v19 = vpack.c.bf16 %v155_v18, %v154_v17 }
  0xec   :  { %188 = vst [vmem:[%s287_s3] sm:$0xff] %v187_v19  }

// kernel: transformer_forward.30
= control target key start
LH: loop header
LB: loop body
LE: loop exit
PB: predicated region body
PF: predicated region fallthrough
CT: control target
= control target key end

     0   :  { %s1355_s15 = smov 0   ;;  %s1357_s16 = smov 0   ;;  %s1541_s0 = inlined_call_operand.vmem [shape: bf16[2,4,8,8], index: 0, kind: input, shape index: {}]   ;;  %s1542_s1 = inlined_call_operand.vmem [shape: bf16[2,4,8,8], index: 1, kind: input, shape index: {}]   ;;  %s1543_s2 = inlined_call_operand.vmem [shape: bf16[2,4,8,8], index: 2, kind: input, shape index: {}]   ;;  %s1544_s3 = inlined_call_operand.vmem [shape: f32[2,8,8], index: 3, kind: input, shape index: {}]   ;;  %s1545_s4 = inlined_call_operand.vmem [shape: bf16[2,4,8,8], index: 4, kind: output, shape index: {}]  }
   0x1   :  { %s1359_s17 = smov 0  }
   0x2 LB: > { %s40_s18 = sadd.s32 1, %s1320_s16  ;;  %p1160_p0 = scmp.ge.s32.totalorder %s1324_s17, 1  ;;  %s1324_s17 = sphi %s1359_s17, %s14_s17   ;;  %s1320_s16 = sphi %s1357_s16, %s1547_s16   ;;  %s1316_s15 = sphi %s1355_s15, %s1546_s15  }
   0x3   : > { %p42_p1 = scmp.ge.s32.totalorder %s40_s18, 2  ;;  %p267_p2 = scmp.lt.s32.totalorder %s1324_s17, 3 }
   0x5   : > { %s1549_s18 = smov (%p42_p1, %s40_s18), 0  ;;  %p268_p3 = pnand %p1160_p0, %p267_p2 }
   0x6   : > { %p342_p4 = scmp.lt.s32.totalorder (!%p268_p3), %s1316_s15, 1 }
   0x7   : > { %271 = sbr.rel (%p268_p3) target bundleno = 806 (0x326), region = 36 }
   0xc   : > { %vm417_vm0 = vcmask 64512   ;;  %v1326_v0 = vmov 0.0   ;;  %s1551_s15 = smov (!%p342_p4, %s1316_s15), 1  ;;  %vm1327_vm1 = vmmov 0   ;;  %vm408_vm2 = vcmask 7168  }
   0xd   : > { %1200 = vmatprep.subr.bf16.mxu0 %v1326_v0  ;;  %1206 = vmatprep.subr.bf16.mxu1 %v1326_v0  ;;  %418 = vst.msk [vmem:[#allocation4] sm:$0xff] %vm417_vm0, %v1326_v0  ;;  %419 = vst.msk [vmem:[#allocation4 + $0x8] sm:$0xff] %vm417_vm0, %v1326_v0  ;;  %s1390_s19 = sshll.u32 %s1551_s15, 4  ;;  %v1328_v13 = vmov -inf   ;;  %s1167_s26 = sshll.u32 %s1551_s15, 3  ;;  %v1329_v39 = vmov 0  }
   0xe   : > { %420 = vst.msk [vmem:[#allocation4 + $0x10] sm:$0xff] %vm417_vm0, %v1326_v0  ;;  %421 = vst.msk [vmem:[#allocation4 + $0x18] sm:$0xff] %vm417_vm0, %v1326_v0  ;;  %1202 = vmatprep.mubr.msk.bf16.mxu0 %vm1327_vm1, %v1326_v0  ;;  %1208 = vmatprep.mubr.msk.bf16.mxu1 %vm1327_vm1, %v1326_v0  ;;  %s365_s22 = scalar_lea.vmem %s1542_s1, %s1390_s19  ;;  %s352_s25 = scalar_lea.vmem %s1541_s0, %s1390_s19  ;;  %vm748_vm3 = vcmask 1043456   ;;  %vm985_vm4 = vcmask 60416  }
   0xf   : > { %v426_v1 = vld [vmem:[%s365_s22] sm:$0xf]  ;;  %v427_v2 = vld [vmem:[%s365_s22 + $0x4] sm:$0xf]  ;;  %v428_v5 = vld [vmem:[%s365_s22 + $0x8] sm:$0xf]  ;;  %s389_s29 = scalar_lea.vmem %s1544_s3, %s1167_s26  ;;  %1276 = vset.pattern.permute.xlu0 %v1329_v39  ;;  %1277 = vset.pattern.permute.xlu1 %v1329_v39  ;;  %s378_s6 = scalar_lea.vmem %s1543_s2, %s1390_s19 }
  0x10   : > { %v440_v3 = vsel %vm417_vm0, %v426_v1, 0  ;;  %v486_v4 = vsel %vm417_vm0, %v427_v2, 0  ;;  %v429_v6 = vld [vmem:[%s365_s22 + $0xc] sm:$0xf]  ;;  %v422_v7 = vld [vmem:[%s352_s25] sm:$0xf]  ;;  %s401_s9 = scalar_lea.vmem %s1545_s4, %s1390_s19 }
  0x11   : > { %1201 = vmatpush3.bf16.xpose.msra.mxu0 %v440_v3  ;;  %1207 = vmatpush3.bf16.xpose.msra.mxu1 %v486_v4  ;;  %v423_v8 = vld [vmem:[%s352_s25 + $0x4] sm:$0xf]  ;;  %v532_v9 = vsel %vm417_vm0, %v428_v5, 0  ;;  %v578_v10 = vsel %vm417_vm0, %v429_v6, 0  ;;  %v424_v11 = vld [vmem:[%s352_s25 + $0x8] sm:$0xf] }
  0x12   : > { %1212 = vmatprep.subr.bf16.mxu0 %v1326_v0  ;;  %1218 = vmatprep.subr.bf16.mxu1 %v1326_v0  ;;  %v425_v12 = vld [vmem:[%s352_s25 + $0xc] sm:$0xf]  ;;  %409 = vst.msk [vmem:[#allocation2] sm:$0xff] %vm408_vm2, %v1328_v13  ;;  %410 = vst.msk [vmem:[#allocation2 + $0x8] sm:$0xff] %vm408_vm2, %v1328_v13  ;;  %v434_v14 = vld [vmem:[%s389_s29] sm:$0xff] }
  0x13   : > { %411 = vst.msk [vmem:[#allocation2 + $0x10] sm:$0xff] %vm408_vm2, %v1328_v13  ;;  %412 = vst.msk [vmem:[#allocation2 + $0x18] sm:$0xff] %vm408_vm2, %v1328_v13  ;;  %v430_v55 = vld [vmem:[%s378_s6] sm:$0xf]  ;;  %v431_v58 = vld [vmem:[%s378_s6 + $0x4] sm:$0xf] }
  0x14   : > { %413 = vst.msk [vmem:[#allocation3] sm:$0xff] %vm408_vm2, %v1326_v0  ;;  %414 = vst.msk [vmem:[#allocation3 + $0x8] sm:$0xff] %vm408_vm2, %v1326_v0  ;;  %v750_v57 = vsel %vm748_vm3, %v430_v55, 0  ;;  %v796_v59 = vsel %vm748_vm3, %v431_v58, 0  ;;  %v432_v60 = vld [vmem:[%s378_s6 + $0x8] sm:$0xf] }
  0x15   : > { %415 = vst.msk [vmem:[#allocation3 + $0x10] sm:$0xff] %vm408_vm2, %v1326_v0  ;;  %416 = vst.msk [vmem:[#allocation3 + $0x18] sm:$0xff] %vm408_vm2, %v1326_v0  ;;  %v842_v61 = vsel %vm748_vm3, %v432_v60, 0  ;;  %v433_v62 = vld [vmem:[%s378_s6 + $0xc] sm:$0xf] }
  0x16   : > { %v888_v63 = vsel %vm748_vm3, %v433_v62, 0 }
  0x18   : > { %1203 = vmatmul.mubr.msk.bf16.vlgmr.msra.gmra.mxu0 %vm417_vm0, %v422_v7  ;;  %1209 = vmatmul.mubr.msk.bf16.vlgmr.msra.gmra.mxu1 %vm417_vm0, %v423_v8 }
  0x19   : > { %1213 = vmatpush3.bf16.xpose.msra.mxu0 %v532_v9  ;;  %1219 = vmatpush3.bf16.xpose.msra.mxu1 %v578_v10  ;;  %v1449_v40 = vld [vmem:[#allocation2] sm:$0xff]  ;;  %v1454_v43 = vld [vmem:[#allocation2 + $0x8] sm:$0xff] }
  0x1a   : > { %1214 = vmatprep.mubr.msk.bf16.mxu0 %vm1327_vm1, %v1326_v0  ;;  %1220 = vmatprep.mubr.msk.bf16.mxu1 %vm1327_vm1, %v1326_v0  ;;  %v1464_v47 = vld [vmem:[#allocation2 + $0x10] sm:$0xff]  ;;  %v1474_v51 = vld [vmem:[#allocation2 + $0x18] sm:$0xff] }
  0x1b   : > { %1224 = vmatprep.subr.bf16.mxu0 %v1326_v0  ;;  %1230 = vmatprep.subr.bf16.mxu1 %v1326_v0 }
  0x1c   : > { %v686_v39 = vld [vmem:[#allocation3 + $0x10] sm:$0xff] }
  0x20   : > { %1215 = vmatmul.mubr.msk.bf16.vlgmr.msra.gmra.mxu0 %vm417_vm0, %v424_v11  ;;  %1221 = vmatmul.mubr.msk.bf16.vlgmr.msra.gmra.mxu1 %vm417_vm0, %v425_v12 }
  0x21   : > { %1226 = vmatprep.mubr.msk.bf16.mxu0 %vm1327_vm1, %v1326_v0  ;;  %1232 = vmatprep.mubr.msk.bf16.mxu1 %vm1327_vm1, %v1326_v0 }
  0x22   : > { %1225 = vmatpush3.bf16.msra.mxu0 %v750_v57  ;;  %1231 = vmatpush3.bf16.msra.mxu1 %v796_v59  ;;  %v713_v57 = vld [vmem:[#allocation4] sm:$0xff]  ;;  %v714_v59 = vld [vmem:[#allocation4 + $0x8] sm:$0xff] }
  0x23   : > { %1236 = vmatprep.subr.bf16.mxu0 %v1326_v0  ;;  %1242 = vmatprep.subr.bf16.mxu1 %v1326_v0 }
  0xd8   : > { %v476_v15 = vpop.f32.mrf.mxu0  ;;  %v522_v16 = vpop.f32.mrf.mxu1 }
  0xd9   : > { %v1436_v17 = vadd.f32 %v476_v15, %v434_v14  ;;  %v1438_v18 = vadd.f32 %v522_v16, %v434_v14 }
  0xda   : > { %v1204_v19 = vpop.f32.mrf.mxu0  ;;  %v1210_v20 = vpop.f32.mrf.mxu1 }
  0xdb   : > { %v624_v21 = vsel %vm417_vm0, %v1436_v17, -inf  ;;  %v627_v24 = vsel %vm417_vm0, %v1438_v18, -inf }
  0xdc   : > { %v525_v22 = vpop.f32.mrf.mxu1  ;;  %625 = vmax.xlane.f32.xlu0 %v624_v21  ;;  %v479_v23 = vpop.f32.mrf.mxu0 }
  0xde   : > { %v1205_v25 = vpop.f32.mrf.mxu0  ;;  %v1211_v26 = vpop.f32.mrf.mxu1 }
  0xe0   : > { %v614_v27 = vpop.f32.mrf.mxu1  ;;  %628 = vmax.xlane.f32.xlu0 %v627_v24  ;;  %v568_v28 = vpop.f32.mrf.mxu0 }
  0xe1   : > { %v1444_v29 = vadd.f32 %v614_v27, %v434_v14  ;;  %v569_v30 = vadd.f32 %v568_v28, %v434_v14 }
  0xe2   : > { %v1216_v31 = vpop.f32.mrf.mxu0  ;;  %v1222_v32 = vpop.f32.mrf.mxu1 }
  0xe3   : > { %v630_v33 = vsel %vm417_vm0, %v569_v30, -inf  ;;  %v633_v36 = vsel %vm417_vm0, %v1444_v29, -inf  ;;  %v684_v32 = vld [vmem:[#allocation3] sm:$0xff] }
  0xe4   : > { %v617_v34 = vpop.f32.mrf.mxu1  ;;  %631 = vmax.xlane.f32.xlu1 %v630_v33  ;;  %v571_v35 = vpop.f32.mrf.mxu0 }
  0xe5   : > { %v685_v35 = vld [vmem:[#allocation3 + $0x8] sm:$0xff] }
  0xe6   : > { %v1217_v37 = vpop.f32.mrf.mxu0  ;;  %v1223_v38 = vpop.f32.mrf.mxu1 }
  0xe8   : > { %634 = vmax.xlane.f32.xlu1 %v633_v36 }
 0x165   : > { %v626_v41 = vpop.xlane.xlu0 %625 }
 0x166   : > { %v1452_v42 = vmax.f32 %v1449_v40, %v626_v41 }
 0x168   : > { %v640_v44 = vsub.f32 %v1449_v40, %v1452_v42  ;;  %938 = vst.msk [vmem:[#allocation2] sm:$0xff] %vm408_vm2, %v1452_v42  ;;  %654 = vperm.xlu0 %1276, %v1452_v42  }
 0x169   : > { %v629_v45 = vpop.xlane.xlu0 %628 }
 0x16a   : > { %v1462_v46 = vmax.f32 %v1454_v43, %v629_v45  ;;  %v644_v24 = vmul.f32 1.442695, %v640_v44 }
 0x16c   : > { %v641_v48 = vsub.f32 %v1454_v43, %v1462_v46  ;;  %939 = vst.msk [vmem:[#allocation2 + $0x8] sm:$0xff] %vm408_vm2, %v1462_v46  ;;  %659 = vperm.xlu1 %1277, %v1462_v46   ;;  %v687_v43 = vld [vmem:[#allocation3 + $0x18] sm:$0xff] }
 0x16d   : > { %v632_v49 = vpop.xlane.xlu1 %631 }
 0x16e   : > { %v1472_v50 = vmax.f32 %v1464_v47, %v632_v49  ;;  %v646_v22 = vmul.f32 1.442695, %v641_v48 }
 0x170   : > { %v642_v52 = vsub.f32 %v1464_v47, %v1472_v50  ;;  %940 = vst.msk [vmem:[#allocation2 + $0x10] sm:$0xff] %vm408_vm2, %v1472_v50  ;;  %664 = vperm.xlu1 %1277, %v1472_v50  }
 0x171   : > { %v635_v53 = vpop.xlane.xlu1 %634 }
 0x172   : > { %v1482_v54 = vmax.f32 %v1474_v51, %v635_v53 }
 0x174   : > { %v643_v56 = vsub.f32 %v1474_v51, %v1482_v54  ;;  %941 = vst.msk [vmem:[#allocation2 + $0x18] sm:$0xff] %vm408_vm2, %v1482_v54  ;;  %669 = vperm.xlu1 %1277, %v1482_v54  }
 0x176   : > { %v650_v27 = vmul.f32 1.442695, %v643_v56 }
 0x1e3   : > { %v655_v1 = vpop.permute.xlu0 %654 }
 0x1e4   : > { %v672_v2 = vsub.f32 %v1436_v17, %v655_v1 }
 0x1e6   : > { %v676_v3 = vmul.f32 1.442695, %v672_v2 }
 0x1e7   : > { %v660_v4 = vpop.permute.xlu1 %659 }
 0x1e8   : > { %1278 = vpow2.f32 %v676_v3  ;;  %v673_v5 = vsub.f32 %v1438_v18, %v660_v4  ;;  %v715_v3 = vld [vmem:[#allocation4 + $0x10] sm:$0xff] }
 0x1ea   : > { %v678_v6 = vmul.f32 1.442695, %v673_v5 }
 0x1eb   : > { %v665_v7 = vpop.permute.xlu1 %664 }
 0x1ec   : > { %1280 = vpow2.f32 %v678_v6  ;;  %v674_v8 = vsub.f32 %v569_v30, %v665_v7 }
 0x1ee   : > { %v680_v9 = vmul.f32 1.442695, %v674_v8 }
 0x1ef   : > { %v670_v10 = vpop.permute.xlu1 %669 }
 0x1f0   : > { %1282 = vpow2.f32 %v680_v9  ;;  %v675_v11 = vsub.f32 %v1444_v29, %v670_v10 }
 0x1f2   : > { %v682_v12 = vmul.f32 1.442695, %v675_v11  ;;  %v716_v11 = vld [vmem:[#allocation4 + $0x18] sm:$0xff] }
 0x1f4   : > { %1284 = vpow2.f32 %v682_v12 }
 0x1f5   : > { %v1279_v13 = vpop.eup %1278  ;;  %1286 = vpow2.f32 %v646_v22 }
 0x1f6   : > { %v692_v14 = vsel %vm417_vm0, %v1279_v13, 0.0  ;;  %v741_v15 = vpack.c.bf16 %v1279_v13, %v1279_v13  ;;  %1288 = vpow2.f32 %v644_v24 }
 0x1f7   : > { %693 = vadd.xlane.f32.xlu1 %v692_v14 }
 0x1f8   : > { %1227 = vmatmul.mubr.msk.bf16.vlgmr.msra.gmra.mxu0 %vm417_vm0, %v741_v15 }
 0x1f9   : > { %v1281_v16 = vpop.eup %1280  ;;  %1237 = vmatpush3.bf16.msra.mxu0 %v842_v61  ;;  %1238 = vmatprep.mubr.msk.bf16.mxu0 %vm1327_vm1, %v1326_v0 }
 0x1fa   : > { %v695_v17 = vsel %vm417_vm0, %v1281_v16, 0.0  ;;  %v742_v18 = vpack.c.bf16 %v1281_v16, %v1281_v16 }
 0x1fb   : > { %696 = vadd.xlane.f32.xlu0 %v695_v17 }
 0x1fc   : > { %1233 = vmatmul.mubr.msk.bf16.vlgmr.msra.gmra.mxu1 %vm417_vm0, %v742_v18 }
 0x1fd   : > { %v1283_v19 = vpop.eup %1282  ;;  %1243 = vmatpush3.bf16.msra.mxu1 %v888_v63  ;;  %1244 = vmatprep.mubr.msk.bf16.mxu1 %vm1327_vm1, %v1326_v0  ;;  %v648_v0 = vmul.f32 1.442695, %v642_v52 }
 0x1fe   : > { %v698_v20 = vsel %vm417_vm0, %v1283_v19, 0.0  ;;  %v743_v21 = vpack.c.bf16 %v1283_v19, %v1283_v19 }
 0x1ff   : > { %699 = vadd.xlane.f32.xlu1 %v698_v20  ;;  %1290 = vpow2.f32 %v648_v0 }
 0x200   : > { %1239 = vmatmul.mubr.msk.bf16.vlgmr.msra.gmra.mxu0 %vm417_vm0, %v743_v21  ;;  %1292 = vpow2.f32 %v650_v27 }
 0x201   : > { %v1285_v23 = vpop.eup %1284 }
 0x202   : > { %v701_v25 = vsel %vm417_vm0, %v1285_v23, 0.0  ;;  %v744_v26 = vpack.c.bf16 %v1285_v23, %v1285_v23  ;;  %v1287_v28 = vpop.eup %1286 }
 0x203   : > { %702 = vadd.xlane.f32.xlu1 %v701_v25  ;;  %v1289_v29 = vpop.eup %1288  ;;  %v689_v37 = vmul.f32 %v1287_v28, %v685_v35 }
 0x204   : > { %1245 = vmatmul.mubr.msk.bf16.vlgmr.msra.gmra.mxu1 %vm417_vm0, %v744_v26  ;;  %v688_v33 = vmul.f32 %v1289_v29, %v684_v32 }
 0x20c   : > { %v1291_v30 = vpop.eup %1290 }
 0x20d   : > { %v1293_v31 = vpop.eup %1292  ;;  %v690_v41 = vmul.f32 %v1291_v30, %v686_v39 }
 0x20e   : > { %v691_v46 = vmul.f32 %v1293_v31, %v687_v43 }
 0x211   : > { %724 = vperm.xlu0 %1276, %v1287_v28  }
 0x214   : > { %719 = vperm.xlu1 %1277, %v1289_v29  }
 0x218   : > { %729 = vperm.xlu1 %1277, %v1291_v30  }
 0x21c   : > { %734 = vperm.xlu1 %1277, %v1293_v31  }
 0x280   : > { %v694_v34 = vpop.xlane.xlu1 %693 }
 0x281   : > { %v704_v36 = vadd.f32 %v694_v34, %v688_v33 }
 0x283   : > { %709 = vst.msk [vmem:[#allocation3] sm:$0xff] %vm408_vm2, %v704_v36 }
 0x284   : > { %v697_v38 = vpop.xlane.xlu0 %696 }
 0x285   : > { %v705_v40 = vadd.f32 %v697_v38, %v689_v37 }
 0x287   : > { %710 = vst.msk [vmem:[#allocation3 + $0x8] sm:$0xff] %vm408_vm2, %v705_v40 }
 0x288   : > { %v700_v42 = vpop.xlane.xlu1 %699 }
 0x289   : > { %v706_v44 = vadd.f32 %v700_v42, %v690_v41 }
 0x28a   : > { %v945_v45 = vld [vmem:[#allocation3] sm:$0xff] }
 0x28b   : > { %711 = vst.msk [vmem:[#allocation3 + $0x10] sm:$0xff] %vm408_vm2, %v706_v44  ;;  %1294 = vrcp.f32 %v945_v45 }
 0x28c   : > { %v703_v47 = vpop.xlane.xlu1 %702  ;;  %v725_v60 = vpop.permute.xlu0 %724 }
 0x28d   : > { %v707_v48 = vadd.f32 %v703_v47, %v691_v46  ;;  %v738_v2 = vmul.f32 %v725_v60, %v714_v59 }
 0x28e   : > { %v946_v49 = vld [vmem:[#allocation3 + $0x8] sm:$0xff] }
 0x28f   : > { %712 = vst.msk [vmem:[#allocation3 + $0x18] sm:$0xff] %vm408_vm2, %v707_v48  ;;  %1296 = vrcp.f32 %v946_v49 }
 0x290   : > { %v720_v56 = vpop.permute.xlu1 %719 }
 0x291   : > { %v737_v58 = vmul.f32 %v720_v56, %v713_v57 }
 0x292   : > { %v947_v50 = vld [vmem:[#allocation3 + $0x10] sm:$0xff] }
 0x293   : > { %1298 = vrcp.f32 %v947_v50 }
 0x294   : > { %v730_v62 = vpop.permute.xlu1 %729 }
 0x295   : > { %v739_v9 = vmul.f32 %v730_v62, %v715_v3 }
 0x296   : > { %v948_v51 = vld [vmem:[#allocation3 + $0x18] sm:$0xff] }
 0x297   : > { %1300 = vrcp.f32 %v948_v51 }
 0x298   : > { %v1295_v52 = vpop.eup %1294  ;;  %v735_v10 = vpop.permute.xlu1 %734 }
 0x299   : > { %959 = vperm.xlu1 %1277, %v1295_v52   ;;  %v740_v17 = vmul.f32 %v735_v10, %v716_v11 }
 0x29c   : > { %v1297_v53 = vpop.eup %1296 }
 0x29d   : > { %964 = vperm.xlu0 %1276, %v1297_v53  }
 0x2a0   : > { %v1299_v54 = vpop.eup %1298 }
 0x2a1   : > { %969 = vperm.xlu1 %1277, %v1299_v54  }
 0x2a4   : > { %v1301_v55 = vpop.eup %1300 }
 0x2a5   : > { %974 = vperm.xlu0 %1276, %v1301_v55  }
 0x2b8   : > { %v786_v61 = vpop.f32.mrf.mxu0 }
 0x2b9   : > { %v930_v63 = vadd.f32 %v786_v61, %v737_v58 }
 0x2ba   : > { %v1228_v1 = vpop.f32.mrf.mxu0 }
 0x2bb   : > { %934 = vst.msk [vmem:[#allocation4] sm:$0xff] %vm417_vm0, %v930_v63 }
 0x2bc   : > { %v789_v4 = vpop.f32.mrf.mxu0  ;;  %v832_v5 = vpop.f32.mrf.mxu1 }
 0x2bd   : > { %v931_v6 = vadd.f32 %v832_v5, %v738_v2 }
 0x2be   : > { %v1229_v7 = vpop.f32.mrf.mxu0  ;;  %v1234_v8 = vpop.f32.mrf.mxu1 }
 0x2bf   : > { %935 = vst.msk [vmem:[#allocation4 + $0x8] sm:$0xff] %vm417_vm0, %v931_v6 }
 0x2c0   : > { %v835_v12 = vpop.f32.mrf.mxu1  ;;  %v878_v13 = vpop.f32.mrf.mxu0 }
 0x2c1   : > { %v932_v14 = vadd.f32 %v878_v13, %v739_v9 }
 0x2c2   : > { %v1235_v15 = vpop.f32.mrf.mxu1  ;;  %v1240_v16 = vpop.f32.mrf.mxu0  ;;  %v953_v26 = vld [vmem:[#allocation4] sm:$0xff] }
 0x2c3   : > { %936 = vst.msk [vmem:[#allocation4 + $0x10] sm:$0xff] %vm417_vm0, %v932_v14 }
 0x2c4   : > { %v881_v18 = vpop.f32.mrf.mxu0  ;;  %v924_v19 = vpop.f32.mrf.mxu1 }
 0x2c5   : > { %v933_v20 = vadd.f32 %v924_v19, %v740_v17 }
 0x2c6   : > { %v1241_v21 = vpop.f32.mrf.mxu0  ;;  %v1246_v22 = vpop.f32.mrf.mxu1  ;;  %v954_v28 = vld [vmem:[#allocation4 + $0x8] sm:$0xff] }
 0x2c7   : > { %937 = vst.msk [vmem:[#allocation4 + $0x18] sm:$0xff] %vm417_vm0, %v933_v20 }
 0x2c8   : > { %v927_v23 = vpop.f32.mrf.mxu1 }
 0x2ca   : > { %v1247_v24 = vpop.f32.mrf.mxu1  ;;  %v955_v33 = vld [vmem:[#allocation4 + $0x10] sm:$0xff] }
 0x2ce   : > { %v956_v37 = vld [vmem:[#allocation4 + $0x18] sm:$0xff] }
 0x314   : > { %v960_v25 = vpop.permute.xlu1 %959 }
 0x315   : > { %v977_v0 = vmul.f32 %v960_v25, %v953_v26 }
 0x317   : > { %v981_v27 = vpack.c.bf16 %v977_v0, %v977_v0 }
 0x318   : > { %v965_v29 = vpop.permute.xlu0 %964 }
 0x319   : > { %986 = vst.msk [vmem:[%s401_s9] sm:$0xf] %vm985_vm4, %v981_v27  ;;  %v978_v30 = vmul.f32 %v965_v29, %v954_v28 }
 0x31b   : > { %v982_v31 = vpack.c.bf16 %v978_v30, %v978_v30 }
 0x31c   : > { %v970_v32 = vpop.permute.xlu1 %969 }
 0x31d   : > { %987 = vst.msk [vmem:[%s401_s9 + $0x4] sm:$0xf] %vm985_vm4, %v982_v31  ;;  %v979_v34 = vmul.f32 %v970_v32, %v955_v33 }
 0x31f   : > { %v983_v35 = vpack.c.bf16 %v979_v34, %v979_v34 }
 0x320   : > { %v975_v36 = vpop.permute.xlu0 %974 }
 0x321   : > { %988 = vst.msk [vmem:[%s401_s9 + $0x8] sm:$0xf] %vm985_vm4, %v983_v35  ;;  %v980_v38 = vmul.f32 %v975_v36, %v956_v37 }
 0x323   : > { %v984_v39 = vpack.c.bf16 %v980_v38, %v980_v38 }
 0x325   : > { %989 = vst.msk [vmem:[%s401_s9 + $0xc] sm:$0xf] %vm985_vm4, %v984_v39 }
 0x326 PF: > { %s14_s17 = sadd.s32 1, %s1324_s17   ;;  %s1546_s15 = smov %s1320_s16 }
 0x327   : > { %p11_p5 = scmp.ge.s32.totalorder %s14_s17, 4   ;;  %s1547_s16 = smov %s1549_s18 }
 0x329   :  { %13 = sbr.rel (!%p11_p5) target bundleno = 2 (0x2), region = 83 }

// kernel: transformer_forward.57
= control target key start
LH: loop header
LB: loop body
LE: loop exit
PB: predicated region body
PF: predicated region fallthrough
CT: control target
= control target key end

     0   :  { %v210_v0 = vmov 0.0   ;;  %vm211_vm0 = vmmov 0   ;;  %s268_s1 = inlined_call_operand.vmem [shape: bf16[128,128], index: 1, kind: input, shape index: {}]   ;;  %s269_s0 = inlined_call_operand.vmem [shape: bf16[16,128], index: 0, kind: input, shape index: {}]   ;;  %s270_s2 = inlined_call_operand.vmem [shape: f32[1,128], index: 2, kind: input, shape index: {}]   ;;  %s271_s3 = inlined_call_operand.vmem [shape: f32[16,128], index: 3, kind: output, shape index: {}]  }
   0x1   :  { %179 = vmatprep.subr.bf16.mxu0 %v210_v0  ;;  %v201_v1 = vld [vmem:[%s268_s1 + $0x38] sm:$0xff]   ;;  %195 = vmatprep.mubr.msk.bf16.mxu0 %vm211_vm0, %v210_v0  ;;  %v202_v2 = vld [vmem:[%s268_s1 + $0x30] sm:$0xff]   ;;  %v203_v3 = vld [vmem:[%s268_s1 + $0x28] sm:$0xff]  }
   0x2   :  { %180 = vmatpush3.bf16.msra.mxu0 %v201_v1  ;;  %v204_v4 = vld [vmem:[%s268_s1 + $0x20] sm:$0xff]   ;;  %v205_v5 = vld [vmem:[%s268_s1 + $0x18] sm:$0xff]   ;;  %v206_v6 = vld [vmem:[%s268_s1 + $0x10] sm:$0xff]  }
   0x3   :  { %181 = vmatprep.subr.bf16.mxu0 %v210_v0  ;;  %v207_v7 = vld [vmem:[%s268_s1 + $0x8] sm:$0xff]   ;;  %v208_v8 = vld [vmem:[%s268_s1] sm:$0xff]  }
   0x4   :  { %v209_v9 = vld [vmem:[%s269_s0] sm:$0xff]  }
   0x5   :  { %v169_v10 = vld [vmem:[%s270_s2] ss:$0 sm:$0xff] }
   0x6   :  { %182 = vmatpush3.bf16.msra.mxu0 %v202_v2 }
   0x7   :  { %183 = vmatprep.subr.bf16.mxu0 %v210_v0 }
   0xa   :  { %184 = vmatpush3.bf16.msra.mxu0 %v203_v3 }
   0xb   :  { %185 = vmatprep.subr.bf16.mxu0 %v210_v0 }
   0xe   :  { %186 = vmatpush3.bf16.msra.mxu0 %v204_v4 }
   0xf   :  { %187 = vmatprep.subr.bf16.mxu0 %v210_v0 }
  0x12   :  { %188 = vmatpush3.bf16.msra.mxu0 %v205_v5 }
  0x13   :  { %189 = vmatprep.subr.bf16.mxu0 %v210_v0 }
  0x16   :  { %190 = vmatpush3.bf16.msra.mxu0 %v206_v6 }
  0x17   :  { %191 = vmatprep.subr.bf16.mxu0 %v210_v0 }
  0x1a   :  { %192 = vmatpush3.bf16.msra.mxu0 %v207_v7 }
  0x1b   :  { %193 = vmatprep.subr.bf16.mxu0 %v210_v0 }
  0x1e   :  { %194 = vmatpush3.bf16.msra.mxu0 %v208_v8 }
  0x21   :  { %196 = vmatmul.mubr.bf16.vlgmr.msra.gmra.mxu0 %v209_v9 }
  0xe1   :  { %v129_v11 = vpop.f32.mrf.mxu0 }
  0xe2   :  { %v152_v12 = vadd.f32 %v169_v10, %v129_v11 }
  0xe3   :  { %v197_v13 = vpop.f32.mrf.mxu0 }
  0xe4   :  { %154 = vst [vmem:[%s271_s3] sm:$0xff] %v152_v12 }
  0xe5   :  { %v132_v14 = vpop.f32.mrf.mxu0 }
  0xe6   :  { %v153_v15 = vadd.f32 %v169_v10, %v132_v14 }
  0xe7   :  { %v198_v16 = vpop.f32.mrf.mxu0 }
  0xe8   :  { %155 = vst [vmem:[%s271_s3 + $0x8] sm:$0xff] %v153_v15 }

</bundles_post_ra>
